<compile_context>
chip_gen: v6e
topology: v6e:2x2x1
jax: 0.10.0
libtpu: 0.0.40
codegen_flags: <defaults>
</compile_context>

<pallas_src>
import functools

import numpy as np
import jax
import jax.numpy as jnp
from jax.experimental import pallas as pl
from jax.experimental.pallas import tpu as pltpu


def _stride3_chain_len(L, n_stages=5):
    """Output length after n_stages of (kernel_size=1, stride=3) Conv/MaxPool."""
    for _ in range(n_stages):
        L = (L - 1) // 3 + 1
    return L


# ----------------------------------------------------------------------------
# Fused kernel
# ----------------------------------------------------------------------------
def _fused_forward_kernel(conv_num, *refs):
    (xt_ref, xc_ref, xl_ref,
     wt1, bt1, wt2, bt2, wt3, bt3,
     wc1, bc1, wc2, bc2, wc3, bc3,
     wl1, bl1, wl2, bl2, wl3, bl3,
     w1_ref, b1, w2, b2, w3, b3,
     o_ref) = refs

    def dense_relu(h, w_ref, b_ref):
        y = jnp.dot(h, w_ref[...], preferred_element_type=jnp.float32) + b_ref[...]
        return jnp.maximum(y, 0.0)

    # --- conv branches: each is three fused (1x1 conv + bias + ReLU) on the
    #     single surviving length position (everything lives in vregs).
    t = dense_relu(dense_relu(dense_relu(xt_ref[...], wt1, bt1), wt2, bt2), wt3, bt3)
    c = dense_relu(dense_relu(dense_relu(xc_ref[...], wc1, bc1), wc2, bc2), wc3, bc3)
    g = dense_relu(dense_relu(dense_relu(xl_ref[...], wl1, bl1), wl2, bl2), wl3, bl3)

    # --- fc_1 via three partial matmuls against static row-slices of W1
    #     (no concat of [t, c, g]; partial products accumulate in f32 vregs).
    w1 = w1_ref[...]
    h = (jnp.dot(t, w1[:conv_num, :], preferred_element_type=jnp.float32)
         + jnp.dot(c, w1[conv_num:2 * conv_num, :], preferred_element_type=jnp.float32)
         + jnp.dot(g, w1[2 * conv_num:, :], preferred_element_type=jnp.float32)
         + b1[...])
    h = jnp.maximum(h, 0.0)
    h = jnp.maximum(jnp.dot(h, w2[...], preferred_element_type=jnp.float32) + b2[...], 0.0)
    o_ref[...] = jnp.dot(h, w3[...], preferred_element_type=jnp.float32) + b3[...]


def _branch_operands(branch_params):
    out = []
    for w, b in branch_params:
        out.append(w)
        out.append(b.reshape(1, -1))
    return out


def fused_forward(params, text, claim, lang, num_rep, num_ret):
    N, _, L = text.shape
    # The PyTorch model's `.squeeze()` + cat(dim=1) + Linear head only works if
    # the stride-3 chain reduces the length dimension to exactly 1.
    assert _stride3_chain_len(L) == 1, (
        f"length {L} does not reduce to 1 through the five stride-3 stages")

    # Only original position 0 survives the composite stride-3**5 subsample
    # (kernel_size=1 everywhere), so extract that single column per branch.
    # torch.cat((text, num_ret, num_rep), dim=1) -> same channel order here.
    xt = jnp.concatenate(
        [text[:, :, 0], num_ret[:, :, 0], num_rep[:, :, 0]], axis=1)   # (N, text_dim+2)
    xc = claim[:, :, 0]                                                # (N, claim_dim)
    xl = lang[:, :, 0]                                                 # (N, lang_dim)

    w1, b1, w2, b2, w3, b3 = params["fc"]
    conv_num = params["conv_text"][-1][0].shape[1]
    num_classes = w3.shape[1]

    operands = (
        [xt, xc, xl]
        + _branch_operands(params["conv_text"])
        + _branch_operands(params["conv_claim"])
        + _branch_operands(params["conv_lang"])
        + [w1, b1.reshape(1, -1), w2, b2.reshape(1, -1), w3, b3.reshape(1, -1)]
    )

    def full_spec(a):
        nd = a.ndim
        return pl.BlockSpec(a.shape, lambda *_, _nd=nd: (0,) * _nd)

    # Advisory cost estimate for XLA scheduling around the tiny custom call.
    weight_elems = sum(int(np.prod(w.shape)) for w, _ in
                       params["conv_text"] + params["conv_claim"] + params["conv_lang"])
    weight_elems += int(np.prod(w1.shape)) + int(np.prod(w2.shape)) + int(np.prod(w3.shape))
    flops = 2 * N * weight_elems
    bytes_accessed = sum(int(np.prod(a.shape)) * 4 for a in operands) + N * num_classes * 4

    kernel = functools.partial(_fused_forward_kernel, conv_num)

    return pl.pallas_call(
        kernel,
        out_shape=jax.ShapeDtypeStruct((N, num_classes), jnp.float32),
        grid=(1,),
        in_specs=[full_spec(a) for a in operands],
        out_specs=pl.BlockSpec((N, num_classes), lambda *_: (0, 0)),
        compiler_params=pltpu.CompilerParams(dimension_semantics=("arbitrary",)),
        cost_estimate=pl.CostEstimate(
            flops=flops, transcendentals=0, bytes_accessed=bytes_accessed),
    )(*operands)


# ----------------------------------------------------------------------------
# Faithful pure-JNP reference (full strided Conv/MaxPool chain, for checking)
# ----------------------------------------------------------------------------
def _conv_branch_ref(x_ncl, branch_params):
    h = jnp.transpose(x_ncl, (0, 2, 1))                  # NLC
    for i, (w, b) in enumerate(branch_params):
        h = h[:, ::3, :]                                 # Conv1d(k=1, stride=3) subsample
        h = jnp.maximum(jnp.einsum("nlc,cd->nld", h, w) + b, 0.0)
        if i < 2:
            h = h[:, ::3, :]                             # MaxPool1d(k=1, stride=3)
            # Dropout(p=0.3): identity in eval mode
    return h


def reference_forward(params, text, claim, lang, num_rep, num_ret):
    text_cat = jnp.concatenate([text, num_ret, num_rep], axis=1)
    t = _conv_branch_ref(text_cat, params["conv_text"])[:, 0, :]
    c = _conv_branch_ref(claim, params["conv_claim"])[:, 0, :]
    g = _conv_branch_ref(lang, params["conv_lang"])[:, 0, :]
    combined = jnp.concatenate([t, c, g], axis=1)
    w1, b1, w2, b2, w3, b3 = params["fc"]
    h = jnp.maximum(combined @ w1 + b1[None, :], 0.0)
    h = jnp.maximum(h @ w2 + b2[None, :], 0.0)
    return h @ w3 + b3[None, :]


# ----------------------------------------------------------------------------
# Deterministic parameter init (PyTorch-style uniform(-1/sqrt(fan_in), ...)).
# Weights stored as (in, out) = transpose of torch's (out, in).
# ----------------------------------------------------------------------------
def _uinit(key, shape, fan_in):
    bound = 1.0 / np.sqrt(fan_in)
    return jax.random.uniform(key, shape, jnp.float32, -bound, bound)


def make_params(key, text_dim, claim_dim, lang_dim, conv_num, fc_num, num_classes):
    keys = iter(jax.random.split(key, 32))

    def conv_params(dims):
        out = []
        for cin, cout in dims:
            out.append((_uinit(next(keys), (cin, cout), cin),
                        _uinit(next(keys), (cout,), cin)))
        return out

    params = {
        "conv_text": conv_params([(text_dim + 2, conv_num),
                                  (conv_num, conv_num),
                                  (conv_num, conv_num)]),
        "conv_claim": conv_params([(claim_dim, conv_num),
                                   (conv_num, conv_num),
                                   (conv_num, conv_num)]),
        "conv_lang": conv_params([(lang_dim, 256), (256, 256), (256, 256)]),
    }
    d_in = conv_num * 2 + 256
    params["fc"] = (
        _uinit(next(keys), (d_in, fc_num), d_in), _uinit(next(keys), (fc_num,), d_in),
        _uinit(next(keys), (fc_num, fc_num), fc_num), _uinit(next(keys), (fc_num,), fc_num),
        _uinit(next(keys), (fc_num, num_classes), fc_num), _uinit(next(keys), (num_classes,), fc_num),
    )
    return params


if __name__ == "__main__":
    N, L = 2, 81                     # L=81 -> 27 -> 9 -> 3 -> 1 -> 1 through the 5 stride-3 stages
    text_dim, claim_dim, lang_dim = 16, 16, 8
    conv_num, fc_num, num_classes = 16, 32, 3

    root = jax.random.PRNGKey(0)
    kp, kt, kc, kl, kr1, kr2 = jax.random.split(root, 6)

    params = make_params(kp, text_dim, claim_dim, lang_dim, conv_num, fc_num, num_classes)

    text = jax.random.normal(kt, (N, text_dim, L), jnp.float32)     # NCL
    claim = jax.random.normal(kc, (N, claim_dim, L), jnp.float32)   # NCL
    lang = jax.random.normal(kl, (N, lang_dim, L), jnp.float32)     # NCL
    num_rep = jax.random.normal(kr1, (N, 1, L), jnp.float32)
    num_ret = jax.random.normal(kr2, (N, 1, L), jnp.float32)

    fwd = jax.jit(fused_forward)
    logits = fwd(params, text, claim, lang, num_rep, num_ret)
    logits = jax.block_until_ready(logits)

    # Check against the faithful (full strided Conv/MaxPool chain) reference.
    ref = reference_forward(params, text, claim, lang, num_rep, num_ret)
    np.testing.assert_allclose(np.asarray(logits), np.asarray(ref), rtol=1e-3, atol=1e-3)
    assert logits.shape == (N, num_classes)

    print("KERNEL_OK")
</pallas_src>

<mosaic_0001>
module attributes {stable_mosaic.version = 11 : i64} {
  func.func @_fused_forward_kernel(%arg0: i32, %arg1: memref<2x18xf32, #tpu.memory_space<vmem>>, %arg2: memref<2x16xf32, #tpu.memory_space<vmem>>, %arg3: memref<2x8xf32, #tpu.memory_space<vmem>>, %arg4: memref<18x16xf32, #tpu.memory_space<vmem>>, %arg5: memref<1x16xf32, #tpu.memory_space<vmem>>, %arg6: memref<16x16xf32, #tpu.memory_space<vmem>>, %arg7: memref<1x16xf32, #tpu.memory_space<vmem>>, %arg8: memref<16x16xf32, #tpu.memory_space<vmem>>, %arg9: memref<1x16xf32, #tpu.memory_space<vmem>>, %arg10: memref<16x16xf32, #tpu.memory_space<vmem>>, %arg11: memref<1x16xf32, #tpu.memory_space<vmem>>, %arg12: memref<16x16xf32, #tpu.memory_space<vmem>>, %arg13: memref<1x16xf32, #tpu.memory_space<vmem>>, %arg14: memref<16x16xf32, #tpu.memory_space<vmem>>, %arg15: memref<1x16xf32, #tpu.memory_space<vmem>>, %arg16: memref<8x256xf32, #tpu.memory_space<vmem>>, %arg17: memref<1x256xf32, #tpu.memory_space<vmem>>, %arg18: memref<256x256xf32, #tpu.memory_space<vmem>>, %arg19: memref<1x256xf32, #tpu.memory_space<vmem>>, %arg20: memref<256x256xf32, #tpu.memory_space<vmem>>, %arg21: memref<1x256xf32, #tpu.memory_space<vmem>>, %arg22: memref<288x32xf32, #tpu.memory_space<vmem>>, %arg23: memref<1x32xf32, #tpu.memory_space<vmem>>, %arg24: memref<32x32xf32, #tpu.memory_space<vmem>>, %arg25: memref<1x32xf32, #tpu.memory_space<vmem>>, %arg26: memref<32x3xf32, #tpu.memory_space<vmem>>, %arg27: memref<1x3xf32, #tpu.memory_space<vmem>>, %arg28: memref<2x3xf32, #tpu.memory_space<vmem>>) attributes {dimension_semantics = [#tpu.dimension_semantics<arbitrary>], iteration_bounds = array<i64: 1>, scalar_prefetch = 0 : i64, scratch_operands = 0 : i64, tpu.core_type = #tpu.core_type<tc>, window_params = [{pipeline_mode = #tpu.pipeline_mode<synchronous>, transform_indices = @transform_0, window_bounds = array<i64: 2, 18>}, {pipeline_mode = #tpu.pipeline_mode<synchronous>, transform_indices = @transform_1, window_bounds = array<i64: 2, 16>}, {pipeline_mode = #tpu.pipeline_mode<synchronous>, transform_indices = @transform_2, window_bounds = array<i64: 2, 8>}, {pipeline_mode = #tpu.pipeline_mode<synchronous>, transform_indices = @transform_3, window_bounds = array<i64: 18, 16>}, {pipeline_mode = #tpu.pipeline_mode<synchronous>, transform_indices = @transform_4, window_bounds = array<i64: 1, 16>}, {pipeline_mode = #tpu.pipeline_mode<synchronous>, transform_indices = @transform_5, window_bounds = array<i64: 16, 16>}, {pipeline_mode = #tpu.pipeline_mode<synchronous>, transform_indices = @transform_6, window_bounds = array<i64: 1, 16>}, {pipeline_mode = #tpu.pipeline_mode<synchronous>, transform_indices = @transform_7, window_bounds = array<i64: 16, 16>}, {pipeline_mode = #tpu.pipeline_mode<synchronous>, transform_indices = @transform_8, window_bounds = array<i64: 1, 16>}, {pipeline_mode = #tpu.pipeline_mode<synchronous>, transform_indices = @transform_9, window_bounds = array<i64: 16, 16>}, {pipeline_mode = #tpu.pipeline_mode<synchronous>, transform_indices = @transform_10, window_bounds = array<i64: 1, 16>}, {pipeline_mode = #tpu.pipeline_mode<synchronous>, transform_indices = @transform_11, window_bounds = array<i64: 16, 16>}, {pipeline_mode = #tpu.pipeline_mode<synchronous>, transform_indices = @transform_12, window_bounds = array<i64: 1, 16>}, {pipeline_mode = #tpu.pipeline_mode<synchronous>, transform_indices = @transform_13, window_bounds = array<i64: 16, 16>}, {pipeline_mode = #tpu.pipeline_mode<synchronous>, transform_indices = @transform_14, window_bounds = array<i64: 1, 16>}, {pipeline_mode = #tpu.pipeline_mode<synchronous>, transform_indices = @transform_15, window_bounds = array<i64: 8, 256>}, {pipeline_mode = #tpu.pipeline_mode<synchronous>, transform_indices = @transform_16, window_bounds = array<i64: 1, 256>}, {pipeline_mode = #tpu.pipeline_mode<synchronous>, transform_indices = @transform_17, window_bounds = array<i64: 256, 256>}, {pipeline_mode = #tpu.pipeline_mode<synchronous>, transform_indices = @transform_18, window_bounds = array<i64: 1, 256>}, {pipeline_mode = #tpu.pipeline_mode<synchronous>, transform_indices = @transform_19, window_bounds = array<i64: 256, 256>}, {pipeline_mode = #tpu.pipeline_mode<synchronous>, transform_indices = @transform_20, window_bounds = array<i64: 1, 256>}, {pipeline_mode = #tpu.pipeline_mode<synchronous>, transform_indices = @transform_21, window_bounds = array<i64: 288, 32>}, {pipeline_mode = #tpu.pipeline_mode<synchronous>, transform_indices = @transform_22, window_bounds = array<i64: 1, 32>}, {pipeline_mode = #tpu.pipeline_mode<synchronous>, transform_indices = @transform_23, window_bounds = array<i64: 32, 32>}, {pipeline_mode = #tpu.pipeline_mode<synchronous>, transform_indices = @transform_24, window_bounds = array<i64: 1, 32>}, {pipeline_mode = #tpu.pipeline_mode<synchronous>, transform_indices = @transform_25, window_bounds = array<i64: 32, 3>}, {pipeline_mode = #tpu.pipeline_mode<synchronous>, transform_indices = @transform_26, window_bounds = array<i64: 1, 3>}, {pipeline_mode = #tpu.pipeline_mode<synchronous>, transform_indices = @transform_27, window_bounds = array<i64: 2, 3>}]} {
    %c0 = arith.constant 0 : index
    %c0_0 = arith.constant 0 : index
    %0 = vector.load %arg1[%c0, %c0_0] : memref<2x18xf32, #tpu.memory_space<vmem>>, vector<2x18xf32>
    %c0_1 = arith.constant 0 : index
    %c0_2 = arith.constant 0 : index
    %1 = vector.load %arg4[%c0_1, %c0_2] : memref<18x16xf32, #tpu.memory_space<vmem>>, vector<18x16xf32>
    %cst = arith.constant dense<0.000000e+00> : vector<2x16xf32>
    %2 = tpu.matmul %0, %1, %cst {dimension_numbers = #tpu.dot_dimension_numbers<[1], [0], [0], [1], [0, 0, 1, 1], [], []>} : vector<2x18xf32>, vector<18x16xf32>, vector<2x16xf32> -> vector<2x16xf32>
    %c0_3 = arith.constant 0 : index
    %c0_4 = arith.constant 0 : index
    %3 = vector.load %arg5[%c0_3, %c0_4] : memref<1x16xf32, #tpu.memory_space<vmem>>, vector<1x16xf32>
    %4 = vector.broadcast %3 : vector<1x16xf32> to vector<2x16xf32>
    %5 = arith.addf %2, %4 : vector<2x16xf32>
    %cst_5 = arith.constant 0.000000e+00 : f32
    %6 = vector.broadcast %cst_5 : f32 to vector<2x16xf32>
    %7 = arith.maximumf %5, %6 : vector<2x16xf32>
    %c0_6 = arith.constant 0 : index
    %c0_7 = arith.constant 0 : index
    %8 = vector.load %arg6[%c0_6, %c0_7] : memref<16x16xf32, #tpu.memory_space<vmem>>, vector<16x16xf32>
    %cst_8 = arith.constant dense<0.000000e+00> : vector<2x16xf32>
    %9 = tpu.matmul %7, %8, %cst_8 {dimension_numbers = #tpu.dot_dimension_numbers<[1], [0], [0], [1], [0, 0, 1, 1], [], []>} : vector<2x16xf32>, vector<16x16xf32>, vector<2x16xf32> -> vector<2x16xf32>
    %c0_9 = arith.constant 0 : index
    %c0_10 = arith.constant 0 : index
    %10 = vector.load %arg7[%c0_9, %c0_10] : memref<1x16xf32, #tpu.memory_space<vmem>>, vector<1x16xf32>
    %11 = vector.broadcast %10 : vector<1x16xf32> to vector<2x16xf32>
    %12 = arith.addf %9, %11 : vector<2x16xf32>
    %cst_11 = arith.constant 0.000000e+00 : f32
    %13 = vector.broadcast %cst_11 : f32 to vector<2x16xf32>
    %14 = arith.maximumf %12, %13 : vector<2x16xf32>
    %c0_12 = arith.constant 0 : index
    %c0_13 = arith.constant 0 : index
    %15 = vector.load %arg8[%c0_12, %c0_13] : memref<16x16xf32, #tpu.memory_space<vmem>>, vector<16x16xf32>
    %cst_14 = arith.constant dense<0.000000e+00> : vector<2x16xf32>
    %16 = tpu.matmul %14, %15, %cst_14 {dimension_numbers = #tpu.dot_dimension_numbers<[1], [0], [0], [1], [0, 0, 1, 1], [], []>} : vector<2x16xf32>, vector<16x16xf32>, vector<2x16xf32> -> vector<2x16xf32>
    %c0_15 = arith.constant 0 : index
    %c0_16 = arith.constant 0 : index
    %17 = vector.load %arg9[%c0_15, %c0_16] : memref<1x16xf32, #tpu.memory_space<vmem>>, vector<1x16xf32>
    %18 = vector.broadcast %17 : vector<1x16xf32> to vector<2x16xf32>
    %19 = arith.addf %16, %18 : vector<2x16xf32>
    %cst_17 = arith.constant 0.000000e+00 : f32
    %20 = vector.broadcast %cst_17 : f32 to vector<2x16xf32>
    %21 = arith.maximumf %19, %20 : vector<2x16xf32>
    %c0_18 = arith.constant 0 : index
    %c0_19 = arith.constant 0 : index
    %22 = vector.load %arg2[%c0_18, %c0_19] : memref<2x16xf32, #tpu.memory_space<vmem>>, vector<2x16xf32>
    %c0_20 = arith.constant 0 : index
    %c0_21 = arith.constant 0 : index
    %23 = vector.load %arg10[%c0_20, %c0_21] : memref<16x16xf32, #tpu.memory_space<vmem>>, vector<16x16xf32>
    %cst_22 = arith.constant dense<0.000000e+00> : vector<2x16xf32>
    %24 = tpu.matmul %22, %23, %cst_22 {dimension_numbers = #tpu.dot_dimension_numbers<[1], [0], [0], [1], [0, 0, 1, 1], [], []>} : vector<2x16xf32>, vector<16x16xf32>, vector<2x16xf32> -> vector<2x16xf32>
    %c0_23 = arith.constant 0 : index
    %c0_24 = arith.constant 0 : index
    %25 = vector.load %arg11[%c0_23, %c0_24] : memref<1x16xf32, #tpu.memory_space<vmem>>, vector<1x16xf32>
    %26 = vector.broadcast %25 : vector<1x16xf32> to vector<2x16xf32>
    %27 = arith.addf %24, %26 : vector<2x16xf32>
    %cst_25 = arith.constant 0.000000e+00 : f32
    %28 = vector.broadcast %cst_25 : f32 to vector<2x16xf32>
    %29 = arith.maximumf %27, %28 : vector<2x16xf32>
    %c0_26 = arith.constant 0 : index
    %c0_27 = arith.constant 0 : index
    %30 = vector.load %arg12[%c0_26, %c0_27] : memref<16x16xf32, #tpu.memory_space<vmem>>, vector<16x16xf32>
    %cst_28 = arith.constant dense<0.000000e+00> : vector<2x16xf32>
    %31 = tpu.matmul %29, %30, %cst_28 {dimension_numbers = #tpu.dot_dimension_numbers<[1], [0], [0], [1], [0, 0, 1, 1], [], []>} : vector<2x16xf32>, vector<16x16xf32>, vector<2x16xf32> -> vector<2x16xf32>
    %c0_29 = arith.constant 0 : index
    %c0_30 = arith.constant 0 : index
    %32 = vector.load %arg13[%c0_29, %c0_30] : memref<1x16xf32, #tpu.memory_space<vmem>>, vector<1x16xf32>
    %33 = vector.broadcast %32 : vector<1x16xf32> to vector<2x16xf32>
    %34 = arith.addf %31, %33 : vector<2x16xf32>
    %cst_31 = arith.constant 0.000000e+00 : f32
    %35 = vector.broadcast %cst_31 : f32 to vector<2x16xf32>
    %36 = arith.maximumf %34, %35 : vector<2x16xf32>
    %c0_32 = arith.constant 0 : index
    %c0_33 = arith.constant 0 : index
    %37 = vector.load %arg14[%c0_32, %c0_33] : memref<16x16xf32, #tpu.memory_space<vmem>>, vector<16x16xf32>
    %cst_34 = arith.constant dense<0.000000e+00> : vector<2x16xf32>
    %38 = tpu.matmul %36, %37, %cst_34 {dimension_numbers = #tpu.dot_dimension_numbers<[1], [0], [0], [1], [0, 0, 1, 1], [], []>} : vector<2x16xf32>, vector<16x16xf32>, vector<2x16xf32> -> vector<2x16xf32>
    %c0_35 = arith.constant 0 : index
    %c0_36 = arith.constant 0 : index
    %39 = vector.load %arg15[%c0_35, %c0_36] : memref<1x16xf32, #tpu.memory_space<vmem>>, vector<1x16xf32>
    %40 = vector.broadcast %39 : vector<1x16xf32> to vector<2x16xf32>
    %41 = arith.addf %38, %40 : vector<2x16xf32>
    %cst_37 = arith.constant 0.000000e+00 : f32
    %42 = vector.broadcast %cst_37 : f32 to vector<2x16xf32>
    %43 = arith.maximumf %41, %42 : vector<2x16xf32>
    %c0_38 = arith.constant 0 : index
    %c0_39 = arith.constant 0 : index
    %44 = vector.load %arg3[%c0_38, %c0_39] : memref<2x8xf32, #tpu.memory_space<vmem>>, vector<2x8xf32>
    %c0_40 = arith.constant 0 : index
    %c0_41 = arith.constant 0 : index
    %45 = vector.load %arg16[%c0_40, %c0_41] : memref<8x256xf32, #tpu.memory_space<vmem>>, vector<8x256xf32>
    %cst_42 = arith.constant dense<0.000000e+00> : vector<2x256xf32>
    %46 = tpu.matmul %44, %45, %cst_42 {dimension_numbers = #tpu.dot_dimension_numbers<[1], [0], [0], [1], [0, 0, 1, 1], [], []>} : vector<2x8xf32>, vector<8x256xf32>, vector<2x256xf32> -> vector<2x256xf32>
    %c0_43 = arith.constant 0 : index
    %c0_44 = arith.constant 0 : index
    %47 = vector.load %arg17[%c0_43, %c0_44] : memref<1x256xf32, #tpu.memory_space<vmem>>, vector<1x256xf32>
    %48 = vector.broadcast %47 : vector<1x256xf32> to vector<2x256xf32>
    %49 = arith.addf %46, %48 : vector<2x256xf32>
    %cst_45 = arith.constant 0.000000e+00 : f32
    %50 = vector.broadcast %cst_45 : f32 to vector<2x256xf32>
    %51 = arith.maximumf %49, %50 : vector<2x256xf32>
    %c0_46 = arith.constant 0 : index
    %c0_47 = arith.constant 0 : index
    %52 = vector.load %arg18[%c0_46, %c0_47] : memref<256x256xf32, #tpu.memory_space<vmem>>, vector<256x256xf32>
    %cst_48 = arith.constant dense<0.000000e+00> : vector<2x256xf32>
    %53 = tpu.matmul %51, %52, %cst_48 {dimension_numbers = #tpu.dot_dimension_numbers<[1], [0], [0], [1], [0, 0, 1, 1], [], []>} : vector<2x256xf32>, vector<256x256xf32>, vector<2x256xf32> -> vector<2x256xf32>
    %c0_49 = arith.constant 0 : index
    %c0_50 = arith.constant 0 : index
    %54 = vector.load %arg19[%c0_49, %c0_50] : memref<1x256xf32, #tpu.memory_space<vmem>>, vector<1x256xf32>
    %55 = vector.broadcast %54 : vector<1x256xf32> to vector<2x256xf32>
    %56 = arith.addf %53, %55 : vector<2x256xf32>
    %cst_51 = arith.constant 0.000000e+00 : f32
    %57 = vector.broadcast %cst_51 : f32 to vector<2x256xf32>
    %58 = arith.maximumf %56, %57 : vector<2x256xf32>
    %c0_52 = arith.constant 0 : index
    %c0_53 = arith.constant 0 : index
    %59 = vector.load %arg20[%c0_52, %c0_53] : memref<256x256xf32, #tpu.memory_space<vmem>>, vector<256x256xf32>
    %cst_54 = arith.constant dense<0.000000e+00> : vector<2x256xf32>
    %60 = tpu.matmul %58, %59, %cst_54 {dimension_numbers = #tpu.dot_dimension_numbers<[1], [0], [0], [1], [0, 0, 1, 1], [], []>} : vector<2x256xf32>, vector<256x256xf32>, vector<2x256xf32> -> vector<2x256xf32>
    %c0_55 = arith.constant 0 : index
    %c0_56 = arith.constant 0 : index
    %61 = vector.load %arg21[%c0_55, %c0_56] : memref<1x256xf32, #tpu.memory_space<vmem>>, vector<1x256xf32>
    %62 = vector.broadcast %61 : vector<1x256xf32> to vector<2x256xf32>
    %63 = arith.addf %60, %62 : vector<2x256xf32>
    %cst_57 = arith.constant 0.000000e+00 : f32
    %64 = vector.broadcast %cst_57 : f32 to vector<2x256xf32>
    %65 = arith.maximumf %63, %64 : vector<2x256xf32>
    %c0_58 = arith.constant 0 : index
    %c0_59 = arith.constant 0 : index
    %66 = vector.load %arg22[%c0_58, %c0_59] : memref<288x32xf32, #tpu.memory_space<vmem>>, vector<288x32xf32>
    %67 = vector.extract_strided_slice %66 {offsets = [0, 0], sizes = [16, 32], strides = [1, 1]} : vector<288x32xf32> to vector<16x32xf32>
    %cst_60 = arith.constant dense<0.000000e+00> : vector<2x32xf32>
    %68 = tpu.matmul %21, %67, %cst_60 {dimension_numbers = #tpu.dot_dimension_numbers<[1], [0], [0], [1], [0, 0, 1, 1], [], []>} : vector<2x16xf32>, vector<16x32xf32>, vector<2x32xf32> -> vector<2x32xf32>
    %69 = vector.extract_strided_slice %66 {offsets = [16, 0], sizes = [16, 32], strides = [1, 1]} : vector<288x32xf32> to vector<16x32xf32>
    %cst_61 = arith.constant dense<0.000000e+00> : vector<2x32xf32>
    %70 = tpu.matmul %43, %69, %cst_61 {dimension_numbers = #tpu.dot_dimension_numbers<[1], [0], [0], [1], [0, 0, 1, 1], [], []>} : vector<2x16xf32>, vector<16x32xf32>, vector<2x32xf32> -> vector<2x32xf32>
    %71 = arith.addf %68, %70 : vector<2x32xf32>
    %72 = vector.extract_strided_slice %66 {offsets = [32, 0], sizes = [256, 32], strides = [1, 1]} : vector<288x32xf32> to vector<256x32xf32>
    %cst_62 = arith.constant dense<0.000000e+00> : vector<2x32xf32>
    %73 = tpu.matmul %65, %72, %cst_62 {dimension_numbers = #tpu.dot_dimension_numbers<[1], [0], [0], [1], [0, 0, 1, 1], [], []>} : vector<2x256xf32>, vector<256x32xf32>, vector<2x32xf32> -> vector<2x32xf32>
    %74 = arith.addf %71, %73 : vector<2x32xf32>
    %c0_63 = arith.constant 0 : index
    %c0_64 = arith.constant 0 : index
    %75 = vector.load %arg23[%c0_63, %c0_64] : memref<1x32xf32, #tpu.memory_space<vmem>>, vector<1x32xf32>
    %76 = vector.broadcast %75 : vector<1x32xf32> to vector<2x32xf32>
    %77 = arith.addf %74, %76 : vector<2x32xf32>
    %cst_65 = arith.constant 0.000000e+00 : f32
    %78 = vector.broadcast %cst_65 : f32 to vector<2x32xf32>
    %79 = arith.maximumf %77, %78 : vector<2x32xf32>
    %c0_66 = arith.constant 0 : index
    %c0_67 = arith.constant 0 : index
    %80 = vector.load %arg24[%c0_66, %c0_67] : memref<32x32xf32, #tpu.memory_space<vmem>>, vector<32x32xf32>
    %cst_68 = arith.constant dense<0.000000e+00> : vector<2x32xf32>
    %81 = tpu.matmul %79, %80, %cst_68 {dimension_numbers = #tpu.dot_dimension_numbers<[1], [0], [0], [1], [0, 0, 1, 1], [], []>} : vector<2x32xf32>, vector<32x32xf32>, vector<2x32xf32> -> vector<2x32xf32>
    %c0_69 = arith.constant 0 : index
    %c0_70 = arith.constant 0 : index
    %82 = vector.load %arg25[%c0_69, %c0_70] : memref<1x32xf32, #tpu.memory_space<vmem>>, vector<1x32xf32>
    %83 = vector.broadcast %82 : vector<1x32xf32> to vector<2x32xf32>
    %84 = arith.addf %81, %83 : vector<2x32xf32>
    %cst_71 = arith.constant 0.000000e+00 : f32
    %85 = vector.broadcast %cst_71 : f32 to vector<2x32xf32>
    %86 = arith.maximumf %84, %85 : vector<2x32xf32>
    %c0_72 = arith.constant 0 : index
    %c0_73 = arith.constant 0 : index
    %87 = vector.load %arg26[%c0_72, %c0_73] : memref<32x3xf32, #tpu.memory_space<vmem>>, vector<32x3xf32>
    %cst_74 = arith.constant dense<0.000000e+00> : vector<2x3xf32>
    %88 = tpu.matmul %86, %87, %cst_74 {dimension_numbers = #tpu.dot_dimension_numbers<[1], [0], [0], [1], [0, 0, 1, 1], [], []>} : vector<2x32xf32>, vector<32x3xf32>, vector<2x3xf32> -> vector<2x3xf32>
    %c0_75 = arith.constant 0 : index
    %c0_76 = arith.constant 0 : index
    %89 = vector.load %arg27[%c0_75, %c0_76] : memref<1x3xf32, #tpu.memory_space<vmem>>, vector<1x3xf32>
    %90 = vector.broadcast %89 : vector<1x3xf32> to vector<2x3xf32>
    %91 = arith.addf %88, %90 : vector<2x3xf32>
    %c0_77 = arith.constant 0 : index
    %c0_78 = arith.constant 0 : index
    %92 = vector.load %arg28[%c0_77, %c0_78] : memref<2x3xf32, #tpu.memory_space<vmem>>, vector<2x3xf32>
    tpu.vector_store %arg28[%c0_77, %c0_78], %91 {strides = array<i32>} : memref<2x3xf32, #tpu.memory_space<vmem>>, vector<2x3xf32>,
    return
  }
  func.func @transform_0(%arg0: i32) -> (i32, i32) {
    %c0_i32 = arith.constant 0 : i32
    %c0_i32_0 = arith.constant 0 : i32
    %c0_i32_1 = arith.constant 0 : i32
    return %c0_i32, %c0_i32_0 : i32, i32
  }
  func.func @transform_1(%arg0: i32) -> (i32, i32) {
    %c0_i32 = arith.constant 0 : i32
    %c0_i32_0 = arith.constant 0 : i32
    %c0_i32_1 = arith.constant 0 : i32
    return %c0_i32, %c0_i32_0 : i32, i32
  }
  func.func @transform_2(%arg0: i32) -> (i32, i32) {
    %c0_i32 = arith.constant 0 : i32
    %c0_i32_0 = arith.constant 0 : i32
    %c0_i32_1 = arith.constant 0 : i32
    return %c0_i32, %c0_i32_0 : i32, i32
  }
  func.func @transform_3(%arg0: i32) -> (i32, i32) {
    %c0_i32 = arith.constant 0 : i32
    %c0_i32_0 = arith.constant 0 : i32
    %c0_i32_1 = arith.constant 0 : i32
    return %c0_i32, %c0_i32_0 : i32, i32
  }
  func.func @transform_4(%arg0: i32) -> (i32, i32) {
    %c0_i32 = arith.constant 0 : i32
    %c0_i32_0 = arith.constant 0 : i32
    %c0_i32_1 = arith.constant 0 : i32
    return %c0_i32, %c0_i32_0 : i32, i32
  }
  func.func @transform_5(%arg0: i32) -> (i32, i32) {
    %c0_i32 = arith.constant 0 : i32
    %c0_i32_0 = arith.constant 0 : i32
    %c0_i32_1 = arith.constant 0 : i32
    return %c0_i32, %c0_i32_0 : i32, i32
  }
  func.func @transform_6(%arg0: i32) -> (i32, i32) {
    %c0_i32 = arith.constant 0 : i32
    %c0_i32_0 = arith.constant 0 : i32
    %c0_i32_1 = arith.constant 0 : i32
    return %c0_i32, %c0_i32_0 : i32, i32
  }
  func.func @transform_7(%arg0: i32) -> (i32, i32) {
    %c0_i32 = arith.constant 0 : i32
    %c0_i32_0 = arith.constant 0 : i32
    %c0_i32_1 = arith.constant 0 : i32
    return %c0_i32, %c0_i32_0 : i32, i32
  }
  func.func @transform_8(%arg0: i32) -> (i32, i32) {
    %c0_i32 = arith.constant 0 : i32
    %c0_i32_0 = arith.constant 0 : i32
    %c0_i32_1 = arith.constant 0 : i32
    return %c0_i32, %c0_i32_0 : i32, i32
  }
  func.func @transform_9(%arg0: i32) -> (i32, i32) {
    %c0_i32 = arith.constant 0 : i32
    %c0_i32_0 = arith.constant 0 : i32
    %c0_i32_1 = arith.constant 0 : i32
    return %c0_i32, %c0_i32_0 : i32, i32
  }
  func.func @transform_10(%arg0: i32) -> (i32, i32) {
    %c0_i32 = arith.constant 0 : i32
    %c0_i32_0 = arith.constant 0 : i32
    %c0_i32_1 = arith.constant 0 : i32
    return %c0_i32, %c0_i32_0 : i32, i32
  }
  func.func @transform_11(%arg0: i32) -> (i32, i32) {
    %c0_i32 = arith.constant 0 : i32
    %c0_i32_0 = arith.constant 0 : i32
    %c0_i32_1 = arith.constant 0 : i32
    return %c0_i32, %c0_i32_0 : i32, i32
  }
  func.func @transform_12(%arg0: i32) -> (i32, i32) {
    %c0_i32 = arith.constant 0 : i32
    %c0_i32_0 = arith.constant 0 : i32
    %c0_i32_1 = arith.constant 0 : i32
    return %c0_i32, %c0_i32_0 : i32, i32
  }
  func.func @transform_13(%arg0: i32) -> (i32, i32) {
    %c0_i32 = arith.constant 0 : i32
    %c0_i32_0 = arith.constant 0 : i32
    %c0_i32_1 = arith.constant 0 : i32
    return %c0_i32, %c0_i32_0 : i32, i32
  }
  func.func @transform_14(%arg0: i32) -> (i32, i32) {
    %c0_i32 = arith.constant 0 : i32
    %c0_i32_0 = arith.constant 0 : i32
    %c0_i32_1 = arith.constant 0 : i32
    return %c0_i32, %c0_i32_0 : i32, i32
  }
  func.func @transform_15(%arg0: i32) -> (i32, i32) {
    %c0_i32 = arith.constant 0 : i32
    %c0_i32_0 = arith.constant 0 : i32
    %c0_i32_1 = arith.constant 0 : i32
    return %c0_i32, %c0_i32_0 : i32, i32
  }
  func.func @transform_16(%arg0: i32) -> (i32, i32) {
    %c0_i32 = arith.constant 0 : i32
    %c0_i32_0 = arith.constant 0 : i32
    %c0_i32_1 = arith.constant 0 : i32
    return %c0_i32, %c0_i32_0 : i32, i32
  }
  func.func @transform_17(%arg0: i32) -> (i32, i32) {
    %c0_i32 = arith.constant 0 : i32
    %c0_i32_0 = arith.constant 0 : i32
    %c0_i32_1 = arith.constant 0 : i32
    return %c0_i32, %c0_i32_0 : i32, i32
  }
  func.func @transform_18(%arg0: i32) -> (i32, i32) {
    %c0_i32 = arith.constant 0 : i32
    %c0_i32_0 = arith.constant 0 : i32
    %c0_i32_1 = arith.constant 0 : i32
    return %c0_i32, %c0_i32_0 : i32, i32
  }
  func.func @transform_19(%arg0: i32) -> (i32, i32) {
    %c0_i32 = arith.constant 0 : i32
    %c0_i32_0 = arith.constant 0 : i32
    %c0_i32_1 = arith.constant 0 : i32
    return %c0_i32, %c0_i32_0 : i32, i32
  }
  func.func @transform_20(%arg0: i32) -> (i32, i32) {
    %c0_i32 = arith.constant 0 : i32
    %c0_i32_0 = arith.constant 0 : i32
    %c0_i32_1 = arith.constant 0 : i32
    return %c0_i32, %c0_i32_0 : i32, i32
  }
  func.func @transform_21(%arg0: i32) -> (i32, i32) {
    %c0_i32 = arith.constant 0 : i32
    %c0_i32_0 = arith.constant 0 : i32
    %c0_i32_1 = arith.constant 0 : i32
    return %c0_i32, %c0_i32_0 : i32, i32
  }
  func.func @transform_22(%arg0: i32) -> (i32, i32) {
    %c0_i32 = arith.constant 0 : i32
    %c0_i32_0 = arith.constant 0 : i32
    %c0_i32_1 = arith.constant 0 : i32
    return %c0_i32, %c0_i32_0 : i32, i32
  }
  func.func @transform_23(%arg0: i32) -> (i32, i32) {
    %c0_i32 = arith.constant 0 : i32
    %c0_i32_0 = arith.constant 0 : i32
    %c0_i32_1 = arith.constant 0 : i32
    return %c0_i32, %c0_i32_0 : i32, i32
  }
  func.func @transform_24(%arg0: i32) -> (i32, i32) {
    %c0_i32 = arith.constant 0 : i32
    %c0_i32_0 = arith.constant 0 : i32
    %c0_i32_1 = arith.constant 0 : i32
    return %c0_i32, %c0_i32_0 : i32, i32
  }
  func.func @transform_25(%arg0: i32) -> (i32, i32) {
    %c0_i32 = arith.constant 0 : i32
    %c0_i32_0 = arith.constant 0 : i32
    %c0_i32_1 = arith.constant 0 : i32
    return %c0_i32, %c0_i32_0 : i32, i32
  }
  func.func @transform_26(%arg0: i32) -> (i32, i32) {
    %c0_i32 = arith.constant 0 : i32
    %c0_i32_0 = arith.constant 0 : i32
    %c0_i32_1 = arith.constant 0 : i32
    return %c0_i32, %c0_i32_0 : i32, i32
  }
  func.func @transform_27(%arg0: i32) -> (i32, i32) {
    %c0_i32 = arith.constant 0 : i32
    %c0_i32_0 = arith.constant 0 : i32
    %c0_i32_1 = arith.constant 0 : i32
    return %c0_i32, %c0_i32_0 : i32, i32
  }
}

</mosaic_0001>

<bundles_post_ra>
// kernel: fused_forward.1
= control target key start
LH: loop header
LB: loop body
LE: loop exit
PB: predicated region body
PF: predicated region fallthrough
CT: control target
= control target key end

     0   :  { %s2987_s0 = inlined_call_operand.vmem [shape: f32[2,18], index: 0, kind: input, shape index: {}]   ;;  %s2988_s1 = inlined_call_operand.vmem [shape: f32[2,16], index: 1, kind: input, shape index: {}]   ;;  %s2989_s2 = inlined_call_operand.vmem [shape: f32[2,8], index: 2, kind: input, shape index: {}]   ;;  %s2990_s3 = inlined_call_operand.vmem [shape: f32[18,16], index: 3, kind: input, shape index: {}]   ;;  %s2991_s4 = inlined_call_operand.hbm [shape: f32[1,16], index: 4, kind: input, shape index: {}]   ;;  %s2992_s5 = inlined_call_operand.hbm [shape: f32[16,16], index: 5, kind: input, shape index: {}]   ;;  %s2993_s6 = inlined_call_operand.hbm [shape: f32[1,16], index: 6, kind: input, shape index: {}]   ;;  %s2994_s7 = inlined_call_operand.hbm [shape: f32[16,16], index: 7, kind: input, shape index: {}]   ;;  %s2995_s8 = inlined_call_operand.hbm [shape: f32[1,16], index: 8, kind: input, shape index: {}]   ;;  %s2996_s9 = inlined_call_operand.hbm [shape: f32[16,16], index: 9, kind: input, shape index: {}]   ;;  %s2997_s10 = inlined_call_operand.hbm [shape: f32[1,16], index: 10, kind: input, shape index: {}]   ;;  %s2998_s11 = inlined_call_operand.hbm [shape: f32[16,16], index: 11, kind: input, shape index: {}]   ;;  %s2999_s12 = inlined_call_operand.hbm [shape: f32[1,16], index: 12, kind: input, shape index: {}]   ;;  %s3000_s13 = inlined_call_operand.hbm [shape: f32[16,16], index: 13, kind: input, shape index: {}]   ;;  %s3001_s14 = inlined_call_operand.hbm [shape: f32[1,16], index: 14, kind: input, shape index: {}]   ;;  %s3002_s15 = inlined_call_operand.hbm [shape: f32[8,256], index: 15, kind: input, shape index: {}]   ;;  %s3003_s16 = inlined_call_operand.hbm [shape: f32[1,256], index: 16, kind: input, shape index: {}]   ;;  %s3004_s17 = inlined_call_operand.vmem [shape: f32[256,256], index: 17, kind: input, shape index: {}]   ;;  %s3005_s18 = inlined_call_operand.hbm [shape: f32[1,256], index: 18, kind: input, shape index: {}]   ;;  %s3006_s19 = inlined_call_operand.hbm [shape: f32[256,256], index: 19, kind: input, shape index: {}]   ;;  %s3007_s20 = inlined_call_operand.hbm [shape: f32[1,256], index: 20, kind: input, shape index: {}]   ;;  %s3008_s21 = inlined_call_operand.vmem [shape: f32[288,32], index: 21, kind: input, shape index: {}]   ;;  %s3009_s22 = inlined_call_operand.hbm [shape: f32[1,32], index: 22, kind: input, shape index: {}]   ;;  %s3010_s23 = inlined_call_operand.hbm [shape: f32[32,32], index: 23, kind: input, shape index: {}]   ;;  %s3011_s24 = inlined_call_operand.hbm [shape: f32[1,32], index: 24, kind: input, shape index: {}]   ;;  %s3012_s25 = inlined_call_operand.vmem [shape: f32[32,3], index: 25, kind: input, shape index: {}]   ;;  %s3013_s26 = inlined_call_operand.hbm [shape: f32[1,3], index: 26, kind: input, shape index: {}]   ;;  %s3014_s27 = inlined_call_operand.hbm [shape: f32[2,3], index: 27, kind: output, shape index: {}]  }
   0x1   :  { %3016 = sst [smem:[#allocation47_spill]] %s2987_s0 }
   0x2   :  { %3017 = sst [smem:[#allocation48_spill]] %s2988_s1 }
   0x3   :  { %3018 = sst [smem:[#allocation49_spill]] %s2989_s2 }
   0x4   :  { %3019 = sst [smem:[#allocation50_spill]] %s2990_s3 }
   0x5   :  { %3020 = sst [smem:[#allocation51_spill]] %s2991_s4 }
   0x6   :  { %3021 = sst [smem:[#allocation52_spill]] %s2992_s5 }
   0x7   :  { %3022 = sst [smem:[#allocation53_spill]] %s2993_s6 }
   0x8   :  { %3023 = sst [smem:[#allocation54_spill]] %s2994_s7 }
   0x9   :  { %3024 = sst [smem:[#allocation55_spill]] %s2995_s8 }
   0xa   :  { %3025 = sst [smem:[#allocation56_spill]] %s2996_s9 }
   0xb   :  { %3026 = sst [smem:[#allocation57_spill]] %s2997_s10 }
   0xc   :  { %3027 = sst [smem:[#allocation58_spill]] %s2998_s11 }
   0xd   :  { %32 = vsyncpa [#allocation3], 0 }
   0xe   :  { %33 = vsyncpa [#allocation6], 0 }
   0xf   :  { %34 = vsyncpa [#allocation9], 0 }
  0x10   :  { %35 = vsyncpa [#allocation12], 0 }
  0x11   :  { %36 = vsyncpa [#allocation15], 0 }
  0x12   :  { %37 = vsyncpa [#allocation18], 0 }
  0x13   :  { %38 = vsyncpa [#allocation21], 0 }
  0x14   :  { %39 = vsyncpa [#allocation24], 0 }
  0x15   :  { %40 = vsyncpa [#allocation27], 0 }
  0x16   :  { %41 = vsyncpa [#allocation30], 0 }
  0x17   :  { %42 = vsyncpa [#allocation33], 0 }
  0x18   :  { %43 = vsyncpa [#allocation4], 0  ;;  %s2330_s7 = smov [#allocation5]  }
  0x19   :  { %s67_s4 = sshll.u32 %s2330_s7, 4  ;;  %s68_s4 = int_to_ptr.vmem [resolvable:$true] %s67_s4 }
  0x1a   :  { %s1894_s8 = scalar_lea.vmem %s68_s4, 256  ;;  %p1899_p1 = scmp.lt.s32.totalorder %s68_s4, %s68_s4 }
  0x1b   :  { %p1895_p0 = scmp.ne.s32.totalorder %s68_s4, %s1894_s8  ;;  %p1900_p2 = scmp.lt.s32.totalorder %s1894_s8, %s1894_s8 }
  0x1d   :  { %p1901_p3 = por %p1900_p2, %p1899_p1 }
  0x1f   :  { %p1902_p4 = pnand %p1901_p3, %p1895_p0 }
  0x21   :  { %1905 = shalt.err (!%p1902_p4)
}
  0x22   :  { %s2331_s30 = smov 128   ;;  %s2332_s9 = smov 8  }
  0x23   :  { %s3028_s0 = sld [smem:[#allocation52_spill]]  ;;  %s2333_s10 = smov [#allocation8]  }
  0x24   :  { %s89_s29 = sshll.u32 %s2333_s10, 4  ;;  %s2334_s1 = smov [#allocation11]   ;;  %s90_s29 = int_to_ptr.vmem [resolvable:$true] %s89_s29 }
  0x25   :  { %s111_s6 = sshll.u32 %s2334_s1, 4  ;;  %s1914_s11 = scalar_lea.vmem %s90_s29, 256  ;;  %s112_s6 = int_to_ptr.vmem [resolvable:$true] %s111_s6 }
  0x26   :  { %p1915_p5 = scmp.ne.s32.totalorder %s90_s29, %s1914_s11  ;;  %p1919_p6 = scmp.lt.s32.totalorder %s90_s29, %s90_s29 }
  0x27   :  { %p1920_p7 = scmp.lt.s32.totalorder %s1914_s11, %s1914_s11 }
  0x29   :  { %73 = dma.hbm_to_vmem [thread:$0]  %s3028_s0, 256, %s68_s4, [#allocation6], %s2331_s30, %s2331_s30, %s2332_s9  }
  0x2a   :  { %p1921_p8 = por %p1920_p7, %p1919_p6 }
  0x2c   :  { %p1922_p9 = pnand %p1921_p8, %p1915_p5 }
  0x2e   :  { %1925 = shalt.err (!%p1922_p9)
}
  0x2f   :  { %s3029_s7 = sld [smem:[#allocation54_spill]]  ;;  %s1934_s4 = scalar_lea.vmem %s112_s6, 256 }
  0x30   :  { %p1935_p10 = scmp.ne.s32.totalorder %s112_s6, %s1934_s4  ;;  %p1939_p11 = scmp.lt.s32.totalorder %s112_s6, %s112_s6 }
  0x31   :  { %p1940_p12 = scmp.lt.s32.totalorder %s1934_s4, %s1934_s4 }
  0x33   :  { %p1941_p13 = por %p1940_p12, %p1939_p11 }
  0x35   :  { %95 = dma.hbm_to_vmem [thread:$0]  %s3029_s7, 256, %s90_s29, [#allocation9], %s2331_s30, %s2331_s30, %s2332_s9  }
  0x36   :  { %p1942_p0 = pnand %p1941_p13, %p1935_p10 }
  0x38   :  { %1945 = shalt.err (!%p1942_p0)
}
  0x39   :  { %s3030_s28 = sld [smem:[#allocation56_spill]]  ;;  %s2335_s0 = smov [#allocation14]  }
  0x3a   :  { %s133_s10 = sshll.u32 %s2335_s0, 4  ;;  %s2336_s1 = smov [#allocation17]   ;;  %s134_s10 = int_to_ptr.vmem [resolvable:$true] %s133_s10 }
  0x3b   :  { %s155_s29 = sshll.u32 %s2336_s1, 4  ;;  %s1954_s11 = scalar_lea.vmem %s134_s10, 256  ;;  %s156_s29 = int_to_ptr.vmem [resolvable:$true] %s155_s29 }
  0x3c   :  { %p1955_p1 = scmp.ne.s32.totalorder %s134_s10, %s1954_s11  ;;  %p1959_p2 = scmp.lt.s32.totalorder %s134_s10, %s134_s10 }
  0x3d   :  { %p1960_p3 = scmp.lt.s32.totalorder %s1954_s11, %s1954_s11 }
  0x3f   :  { %117 = dma.hbm_to_vmem [thread:$0]  %s3030_s28, 256, %s112_s6, [#allocation12], %s2331_s30, %s2331_s30, %s2332_s9  }
  0x40   :  { %p1961_p4 = por %p1960_p3, %p1959_p2 }
  0x42   :  { %p1962_p5 = pnand %p1961_p4, %p1955_p1 }
  0x44   :  { %1965 = shalt.err (!%p1962_p5)
}
  0x45   :  { %s3031_s7 = sld [smem:[#allocation58_spill]]  ;;  %s1974_s6 = scalar_lea.vmem %s156_s29, 256 }
  0x46   :  { %p1975_p6 = scmp.ne.s32.totalorder %s156_s29, %s1974_s6  ;;  %p1979_p7 = scmp.lt.s32.totalorder %s156_s29, %s156_s29 }
  0x47   :  { %p1980_p8 = scmp.lt.s32.totalorder %s1974_s6, %s1974_s6 }
  0x49   :  { %p1981_p9 = por %p1980_p8, %p1979_p7 }
  0x4b   :  { %139 = dma.hbm_to_vmem [thread:$0]  %s3031_s7, 256, %s134_s10, [#allocation15], %s2331_s30, %s2331_s30, %s2332_s9  }
  0x4c   :  { %p1982_p10 = pnand %p1981_p9, %p1975_p6 }
  0x4e   :  { %1985 = shalt.err (!%p1982_p10)
}
  0x4f   :  { %161 = dma.hbm_to_vmem [thread:$0]  %s3000_s13, 256, %s156_s29, [#allocation18], %s2331_s30, %s2331_s30, %s2332_s9  }
  0x50   :  { %s2337_s5 = smov [#allocation20]   ;;  %s2338_s0 = smov [#allocation23]  }
  0x51   :  { %s178_s28 = sshll.u32 %s2337_s5, 4  ;;  %s200_s10 = sshll.u32 %s2338_s0, 4  ;;  %s179_s28 = int_to_ptr.vmem [resolvable:$true] %s178_s28  ;;  %s201_s10 = int_to_ptr.vmem [resolvable:$true] %s200_s10 }
  0x52   :  { %s1994_s1 = scalar_lea.vmem %s179_s28, 256  ;;  %p1999_p12 = scmp.lt.s32.totalorder %s179_s28, %s179_s28 }
  0x53   :  { %p1995_p11 = scmp.ne.s32.totalorder %s179_s28, %s1994_s1  ;;  %p2000_p13 = scmp.lt.s32.totalorder %s1994_s1, %s1994_s1 }
  0x55   :  { %p2001_p0 = por %p2000_p13, %p1999_p12 }
  0x57   :  { %p2002_p1 = pnand %p2001_p0, %p1995_p11 }
  0x59   :  { %2005 = shalt.err (!%p2002_p1)
}
  0x5a   :  { %181 = dma.hbm_to_vmem [thread:$0]  %s3002_s15, 256, %s179_s28, [#allocation21]  }
  0x5b   :  { %s2014_s3 = scalar_lea.vmem %s201_s10, 32  ;;  %p2019_p3 = scmp.lt.s32.totalorder %s201_s10, %s201_s10 }
  0x5c   :  { %p2015_p2 = scmp.ne.s32.totalorder %s201_s10, %s2014_s3  ;;  %p2020_p4 = scmp.lt.s32.totalorder %s2014_s3, %s2014_s3 }
  0x5e   :  { %p2021_p5 = por %p2020_p4, %p2019_p3 }
  0x60   :  { %p2022_p6 = pnand %p2021_p5, %p2015_p2 }
  0x62   :  { %2025 = shalt.err (!%p2022_p6)
}
  0x63   :  { %203 = dma.hbm_to_vmem [thread:$0]  %s3005_s18, 32, %s201_s10, [#allocation24]  }
  0x64   :  { %s2339_s7 = smov [#allocation26]   ;;  %s2340_s4 = smov [#allocation29]  }
  0x65   :  { %s222_s6 = sshll.u32 %s2339_s7, 4  ;;  %s243_s8 = sshll.u32 %s2340_s4, 4  ;;  %s223_s6 = int_to_ptr.vmem [resolvable:$true] %s222_s6  ;;  %s244_s8 = int_to_ptr.vmem [resolvable:$true] %s243_s8 }
  0x66   :  { %s2034_s5 = scalar_lea.vmem %s223_s6, 32  ;;  %p2039_p8 = scmp.lt.s32.totalorder %s223_s6, %s223_s6 }
  0x67   :  { %p2035_p7 = scmp.ne.s32.totalorder %s223_s6, %s2034_s5  ;;  %p2040_p9 = scmp.lt.s32.totalorder %s2034_s5, %s2034_s5 }
  0x69   :  { %p2041_p10 = por %p2040_p9, %p2039_p8 }
  0x6b   :  { %p2042_p11 = pnand %p2041_p10, %p2035_p7 }
  0x6d   :  { %2045 = shalt.err (!%p2042_p11)
}
  0x6e   :  { %225 = dma.hbm_to_vmem [thread:$0]  %s3007_s20, 32, %s223_s6, [#allocation27]  }
  0x6f   :  { %s2054_s0 = scalar_lea.vmem %s244_s8, 512  ;;  %p2059_p13 = scmp.lt.s32.totalorder %s244_s8, %s244_s8 }
  0x70   :  { %p2055_p12 = scmp.ne.s32.totalorder %s244_s8, %s2054_s0  ;;  %p2060_p0 = scmp.lt.s32.totalorder %s2054_s0, %s2054_s0 }
  0x72   :  { %p2061_p1 = por %p2060_p0, %p2059_p13 }
  0x74   :  { %p2062_p2 = pnand %p2061_p1, %p2055_p12 }
  0x76   :  { %2065 = shalt.err (!%p2062_p2)
}
  0x77   :  { %249 = dma.hbm_to_vmem [thread:$0]  %s3010_s23, 512, %s244_s8, [#allocation30], %s2331_s30, %s2331_s30, %s2332_s9  }
  0x78   :  { %s2341_s1 = smov [#allocation2]   ;;  %s2342_s2 = smov [#allocation7]  }
  0x79   :  { %s58_s11 = sshll.u32 %s2341_s1, 4  ;;  %s80_s20 = sshll.u32 %s2342_s2, 4  ;;  %s59_s11 = int_to_ptr.vmem [resolvable:$true] %s58_s11  ;;  %s81_s20 = int_to_ptr.vmem [resolvable:$true] %s80_s20 }
  0x7a   :  { %s2074_s3 = scalar_lea.vmem %s59_s11, 16  ;;  %s2078_s13 = scalar_lea.vmem %s59_s11, 32 }
  0x7b   :  { %p2075_p3 = scmp.ne.s32.totalorder %s59_s11, %s2074_s3  ;;  %p2079_p4 = scmp.lt.s32.totalorder %s59_s11, %s59_s11 }
  0x7c   :  { %p2080_p5 = scmp.lt.s32.totalorder %s2078_s13, %s2074_s3 }
  0x7e   :  { %p2081_p6 = por %p2080_p5, %p2079_p4 }
  0x80   :  { %p2082_p7 = pnand %p2081_p6, %p2075_p3 }
  0x82   :  { %2085 = shalt.err (!%p2082_p7)
}
  0x83   :  { %s3032_s6 = sld [smem:[#allocation51_spill]]  ;;  %s2094_s4 = scalar_lea.vmem %s81_s20, 16 }
  0x84   :  { %p2095_p8 = scmp.ne.s32.totalorder %s81_s20, %s2094_s4  ;;  %s2098_s23 = scalar_lea.vmem %s81_s20, 32 }
  0x85   :  { %p2099_p9 = scmp.lt.s32.totalorder %s81_s20, %s81_s20  ;;  %p2100_p10 = scmp.lt.s32.totalorder %s2098_s23, %s2094_s4 }
  0x87   :  { %p2101_p11 = por %p2100_p10, %p2099_p9 }
  0x89   :  { %61 = dma.hbm_to_vmem [thread:$0]  %s3032_s6, 16, %s59_s11, [#allocation3]  }
  0x8a   :  { %p2102_p12 = pnand %p2101_p11, %p2095_p8 }
  0x8c   :  { %2105 = shalt.err (!%p2102_p12)
}
  0x8d   :  { %s3033_s8 = sld [smem:[#allocation53_spill]]  ;;  %s2343_s5 = smov [#allocation10]  }
  0x8e   :  { %s102_s15 = sshll.u32 %s2343_s5, 4  ;;  %s2344_s28 = smov [#allocation13]   ;;  %s103_s15 = int_to_ptr.vmem [resolvable:$true] %s102_s15 }
  0x8f   :  { %s124_s0 = sshll.u32 %s2344_s28, 4  ;;  %s2114_s18 = scalar_lea.vmem %s103_s15, 16  ;;  %s125_s0 = int_to_ptr.vmem [resolvable:$true] %s124_s0 }
  0x90   :  { %p2115_p13 = scmp.ne.s32.totalorder %s103_s15, %s2114_s18  ;;  %s2118_s10 = scalar_lea.vmem %s103_s15, 32 }
  0x91   :  { %p2119_p0 = scmp.lt.s32.totalorder %s103_s15, %s103_s15  ;;  %p2120_p1 = scmp.lt.s32.totalorder %s2118_s10, %s2114_s18 }
  0x93   :  { %83 = dma.hbm_to_vmem [thread:$0]  %s3033_s8, 16, %s81_s20, [#allocation6]  }
  0x94   :  { %p2121_p2 = por %p2120_p1, %p2119_p0 }
  0x96   :  { %p2122_p3 = pnand %p2121_p2, %p2115_p13 }
  0x98   :  { %2125 = shalt.err (!%p2122_p3)
}
  0x99   :  { %s3034_s2 = sld [smem:[#allocation55_spill]]  ;;  %s2134_s3 = scalar_lea.vmem %s125_s0, 16 }
  0x9a   :  { %p2135_p4 = scmp.ne.s32.totalorder %s125_s0, %s2134_s3  ;;  %s2138_s20 = scalar_lea.vmem %s125_s0, 32 }
  0x9b   :  { %p2139_p5 = scmp.lt.s32.totalorder %s125_s0, %s125_s0  ;;  %p2140_p6 = scmp.lt.s32.totalorder %s2138_s20, %s2134_s3 }
  0x9d   :  { %p2141_p7 = por %p2140_p6, %p2139_p5 }
  0x9f   :  { %105 = dma.hbm_to_vmem [thread:$0]  %s3034_s2, 16, %s103_s15, [#allocation9]  }
  0xa0   :  { %p2142_p8 = pnand %p2141_p7, %p2135_p4 }
  0xa2   :  { %2145 = shalt.err (!%p2142_p8)
}
  0xa3   :  { %s3035_s7 = sld [smem:[#allocation57_spill]]  ;;  %s2345_s6 = smov [#allocation16]  }
  0xa4   :  { %s146_s4 = sshll.u32 %s2345_s6, 4  ;;  %s2346_s23 = smov [#allocation19]   ;;  %s147_s4 = int_to_ptr.vmem [resolvable:$true] %s146_s4 }
  0xa5   :  { %s168_s30 = sshll.u32 %s2346_s23, 4  ;;  %s2154_s9 = scalar_lea.vmem %s147_s4, 16  ;;  %s169_s30 = int_to_ptr.vmem [resolvable:$true] %s168_s30 }
  0xa6   :  { %p2155_p9 = scmp.ne.s32.totalorder %s147_s4, %s2154_s9  ;;  %s2158_s8 = scalar_lea.vmem %s147_s4, 32 }
  0xa7   :  { %p2159_p10 = scmp.lt.s32.totalorder %s147_s4, %s147_s4  ;;  %p2160_p11 = scmp.lt.s32.totalorder %s2158_s8, %s2154_s9 }
  0xa9   :  { %127 = dma.hbm_to_vmem [thread:$0]  %s3035_s7, 16, %s125_s0, [#allocation12]  }
  0xaa   :  { %p2161_p12 = por %p2160_p11, %p2159_p10 }
  0xac   :  { %p2162_p13 = pnand %p2161_p12, %p2155_p9 }
  0xae   :  { %2165 = shalt.err (!%p2162_p13)
}
  0xaf   :  { %149 = dma.hbm_to_vmem [thread:$0]  %s2999_s12, 16, %s147_s4, [#allocation15]  }
  0xb0   :  { %s2174_s28 = scalar_lea.vmem %s169_s30, 16  ;;  %s2178_s0 = scalar_lea.vmem %s169_s30, 32 }
  0xb1   :  { %p2175_p0 = scmp.ne.s32.totalorder %s169_s30, %s2174_s28  ;;  %p2179_p1 = scmp.lt.s32.totalorder %s169_s30, %s169_s30 }
  0xb2   :  { %p2180_p2 = scmp.lt.s32.totalorder %s2178_s0, %s2174_s28 }
  0xb4   :  { %p2181_p3 = por %p2180_p2, %p2179_p1 }
  0xb6   :  { %p2182_p4 = pnand %p2181_p3, %p2175_p0 }
  0xb8   :  { %2185 = shalt.err (!%p2182_p4)
}
  0xb9   :  { %171 = dma.hbm_to_vmem [thread:$0]  %s3001_s14, 16, %s169_s30, [#allocation18]  }
  0xba   :  { %s2347_s1 = smov [#allocation22]   ;;  %s2348_s2 = smov [#allocation25]  }
  0xbb   :  { %s188_s11 = sshll.u32 %s2347_s1, 4  ;;  %s209_s3 = sshll.u32 %s2348_s2, 4  ;;  %s189_s11 = int_to_ptr.vmem [resolvable:$true] %s188_s11  ;;  %s210_s3 = int_to_ptr.vmem [resolvable:$true] %s209_s3 }
  0xbc   :  { %s2194_s20 = scalar_lea.vmem %s189_s11, 32  ;;  %p2199_p6 = scmp.lt.s32.totalorder %s189_s11, %s189_s11 }
  0xbd   :  { %p2195_p5 = scmp.ne.s32.totalorder %s189_s11, %s2194_s20  ;;  %p2200_p7 = scmp.lt.s32.totalorder %s2194_s20, %s2194_s20 }
  0xbf   :  { %p2201_p8 = por %p2200_p7, %p2199_p6 }
  0xc1   :  { %p2202_p9 = pnand %p2201_p8, %p2195_p5 }
  0xc3   :  { %2205 = shalt.err (!%p2202_p9)
}
  0xc4   :  { %191 = dma.hbm_to_vmem [thread:$0]  %s3003_s16, 32, %s189_s11, [#allocation21]  }
  0xc5   :  { %s2214_s29 = scalar_lea.vmem %s210_s3, 8192  ;;  %p2219_p11 = scmp.lt.s32.totalorder %s210_s3, %s210_s3 }
  0xc6   :  { %p2215_p10 = scmp.ne.s32.totalorder %s210_s3, %s2214_s29  ;;  %p2220_p12 = scmp.lt.s32.totalorder %s2214_s29, %s2214_s29 }
  0xc8   :  { %p2221_p13 = por %p2220_p12, %p2219_p11 }
  0xca   :  { %p2222_p0 = pnand %p2221_p13, %p2215_p10 }
  0xcc   :  { %2225 = shalt.err (!%p2222_p0)
}
  0xcd   :  { %s2349_s14 = smov 256   ;;  %s2350_s7 = smov 16  }
  0xce   :  { %215 = dma.hbm_to_vmem [thread:$0]  %s3006_s19, 8192, %s210_s3, [#allocation24], %s2349_s14, %s2349_s14, %s2350_s7  }
  0xcf   :  { %s2351_s23 = smov [#allocation28]   ;;  %s2352_s9 = smov [#allocation31]  }
  0xd0   :  { %s234_s30 = sshll.u32 %s2351_s23, 4  ;;  %s256_s8 = sshll.u32 %s2352_s9, 4  ;;  %s235_s30 = int_to_ptr.vmem [resolvable:$true] %s234_s30  ;;  %s257_s8 = int_to_ptr.vmem [resolvable:$true] %s256_s8 }
  0xd1   :  { %s2234_s16 = scalar_lea.vmem %s235_s30, 16  ;;  %s2238_s5 = scalar_lea.vmem %s235_s30, 32 }
  0xd2   :  { %p2235_p1 = scmp.ne.s32.totalorder %s235_s30, %s2234_s16  ;;  %p2239_p2 = scmp.lt.s32.totalorder %s235_s30, %s235_s30 }
  0xd3   :  { %p2240_p3 = scmp.lt.s32.totalorder %s2238_s5, %s2234_s16 }
  0xd5   :  { %p2241_p4 = por %p2240_p3, %p2239_p2 }
  0xd7   :  { %p2242_p5 = pnand %p2241_p4, %p2235_p1 }
  0xd9   :  { %2245 = shalt.err (!%p2242_p5)
}
  0xda   :  { %237 = dma.hbm_to_vmem [thread:$0]  %s3009_s22, 16, %s235_s30, [#allocation27]  }
  0xdb   :  { %s2254_s0 = scalar_lea.vmem %s257_s8, 16  ;;  %s2258_s19 = scalar_lea.vmem %s257_s8, 32 }
  0xdc   :  { %p2255_p6 = scmp.ne.s32.totalorder %s257_s8, %s2254_s0  ;;  %p2259_p7 = scmp.lt.s32.totalorder %s257_s8, %s257_s8 }
  0xdd   :  { %p2260_p8 = scmp.lt.s32.totalorder %s2258_s19, %s2254_s0 }
  0xdf   :  { %p2261_p9 = por %p2260_p8, %p2259_p7 }
  0xe1   :  { %p2262_p10 = pnand %p2261_p9, %p2255_p6 }
  0xe3   :  { %2265 = shalt.err (!%p2262_p10)
}
  0xe4   :  { %259 = dma.hbm_to_vmem [thread:$0]  %s3011_s24, 16, %s257_s8, [#allocation30]  }
  0xe5   :  { %s2353_s1 = smov [#allocation32]  }
  0xe6   :  { %s268_s11 = sshll.u32 %s2353_s1, 4  ;;  %s269_s11 = int_to_ptr.vmem [resolvable:$true] %s268_s11 }
  0xe7   :  { %s2274_s2 = scalar_lea.vmem %s269_s11, 16  ;;  %s2278_s3 = scalar_lea.vmem %s269_s11, 32 }
  0xe8   :  { %p2275_p11 = scmp.ne.s32.totalorder %s269_s11, %s2274_s2  ;;  %p2279_p12 = scmp.lt.s32.totalorder %s269_s11, %s269_s11 }
  0xe9   :  { %p2280_p13 = scmp.lt.s32.totalorder %s2278_s3, %s2274_s2 }
  0xeb   :  { %p2281_p0 = por %p2280_p13, %p2279_p12 }
  0xed   :  { %p2282_p1 = pnand %p2281_p0, %p2275_p11 }
  0xef   :  { %2285 = shalt.err (!%p2282_p1)
}
  0xf0   :  { %271 = dma.hbm_to_vmem [thread:$0]  %s3013_s26, 16, %s269_s11, [#allocation33]  }
  0xf1   :  { %2306 = dma.done.wait [#allocation3], 16  }
  0xf2   :  { %2307 = vsyncadd [#allocation3], 4294967280 }
  0xf3   :  { %2308 = dma.done.wait [#allocation6], 272  }
  0xf4   :  { %2309 = vsyncadd [#allocation6], 4294967024 }
  0xf5   :  { %2310 = dma.done.wait [#allocation9], 272  }
  0xf6   :  { %2311 = vsyncadd [#allocation9], 4294967024 }
  0xf7   :  { %2312 = dma.done.wait [#allocation12], 272  }
  0xf8   :  { %2313 = vsyncadd [#allocation12], 4294967024 }
  0xf9   :  { %2314 = dma.done.wait [#allocation15], 272  }
  0xfa   :  { %2315 = vsyncadd [#allocation15], 4294967024 }
  0xfb   :  { %2316 = dma.done.wait [#allocation18], 272  }
  0xfc   :  { %2317 = vsyncadd [#allocation18], 4294967024 }
  0xfd   :  { %2318 = dma.done.wait [#allocation21], 288  }
  0xfe   :  { %2319 = vsyncadd [#allocation21], 4294967008 }
  0xff   :  { %2320 = dma.done.wait [#allocation24], 8224  }
 0x100   :  { %2321 = vsyncadd [#allocation24], 4294959072 }
 0x101   :  { %2322 = dma.done.wait [#allocation27], 48  }
 0x102   :  { %2323 = vsyncadd [#allocation27], 4294967248 }
 0x103   :  { %2324 = dma.done.wait [#allocation30], 528  }
 0x104   :  { %2325 = vsyncadd [#allocation30], 4294966768 }
 0x105   :  { %2326 = dma.done.wait [#allocation33], 16  }
 0x106   :  { %2327 = vsyncadd [#allocation33], 4294967280  ;;  %v2354_v0 = vmov 0.0   ;;  %vm2355_vm0 = vmmov 0   ;;  %vm347_vm1 = vcmask 1041408   ;;  %s3036_s12 = sld [smem:[#allocation50_spill]]  ;;  %v844_v35 = vlaneseq }
 0x107   :  { %1779 = vmatprep.subr.mxu1 %v2354_v0  ;;  %1785 = vmatprep.mubr.msk.f32.mxu1 %vm2355_vm0, %v2354_v0  ;;  %s3037_s23 = sld [smem:[#allocation47_spill]]  ;;  %vm343_vm2 = vcmask 146432   ;;  %v423_v5 = vld [vmem:[#allocation5 + $0x8] sm:$0xff]  ;;  %v422_v6 = vld [vmem:[#allocation5] sm:$0xff]  ;;  %vm431_vm3 = vcmask 130048   ;;  %v506_v17 = vld [vmem:[#allocation8] sm:$0xff] }
 0x108   :  { %1802 = vmatprep.subr.mxu0 %v2354_v0  ;;  %1806 = vmatprep.mubr.msk.f32.mxu0 %vm2355_vm0, %v2354_v0  ;;  %v591_v7 = vld [vmem:[#allocation11 + $0x8] sm:$0xff]  ;;  %v590_v8 = vld [vmem:[#allocation11] sm:$0xff]  ;;  %s3038_s8 = sld [smem:[#allocation48_spill]]  ;;  %v1688_v10 = vld [vmem:[#allocation2] ss:$0 sm:$0xff]  ;;  %vm854_vm4 = vcmask 64512  }
 0x109   :  { %1803 = vmatpush3.msra.mxu0 %v591_v7  ;;  %v507_v15 = vld [vmem:[#allocation8 + $0x8] sm:$0xff]  ;;  %v1691_v19 = vld [vmem:[#allocation7] ss:$0 sm:$0xff]  ;;  %v1695_v20 = vld [vmem:[#allocation13] ss:$0 sm:$0xff]  ;;  %s3039_s15 = sld [smem:[#allocation49_spill]] }
 0x10a   :  { %1804 = vmatprep.subr.mxu0 %v2354_v0  ;;  %v674_v26 = vld [vmem:[#allocation14 + $0x8] sm:$0xff]  ;;  %v673_v28 = vld [vmem:[#allocation14] sm:$0xff]  ;;  %v756_v33 = vld [vmem:[#allocation17] sm:$0xff]  ;;  %v2626_v36 = vshrl.u32 %v844_v35, 7  ;;  %vm1502_vm5 = vcmask 261120   ;;  %s2356_s29 = smov [#allocation34]  }
 0x10b   :  { %1805 = vmatpush3.msra.mxu0 %v590_v8  ;;  %v841_v29 = vld [vmem:[#allocation20 + $0x8] sm:$0xff]  ;;  %v840_v30 = vld [vmem:[#allocation20] sm:$0xff]  ;;  %v757_v32 = vld [vmem:[#allocation17 + $0x8] sm:$0xff]  ;;  %s1669_s14 = sshll.u32 %s2356_s29, 4  ;;  %vm1661_vm6 = vcmask 17408   ;;  %s1670_s14 = int_to_ptr.vmem [resolvable:$true] %s1669_s14 }
 0x10c   :  { %v335_v1 = vld [vmem:[%s3036_s12 + $0x10] sm:$0x3]  ;;  %v334_v2 = vld [vmem:[%s3036_s12 + $0x8] sm:$0xff]  ;;  %v333_v3 = vld [vmem:[%s3036_s12] sm:$0xff]  ;;  %1816 = vmatprep.subr.mxu0 %v2354_v0  ;;  %v2631_v40 = vsub.s32 1, %v2626_v36  ;;  %s2286_s7 = scalar_lea.vmem %s1670_s14, 32  ;;  %p2291_p3 = scmp.lt.s32.totalorder %s1670_s14, %s1670_s14 }
 0x10d   :  { %1780 = vmatpush3.msk.msra.mxu1 %vm347_vm1, %v335_v1  ;;  %v332_v4 = vld [vmem:[%s3037_s23] sm:$0x3]  ;;  %v962_v34 = vld [vmem:[%s3004_s17 + $0xf8] sm:$0xff]  ;;  %v1697_v39 = vld [vmem:[#allocation16] ss:$0 sm:$0xff]  ;;  %p2287_p2 = scmp.ne.s32.totalorder %s1670_s14, %s2286_s7  ;;  %p2292_p4 = scmp.lt.s32.totalorder %s2286_s7, %s2286_s7 }
 0x10e   :  { %1781 = vmatprep.subr.mxu1 %v2354_v0  ;;  %v589_v9 = vld [vmem:[%s3038_s8] sm:$0x3]  ;;  %v2633_v42 = vld [vmem:[#allocation22] sm:$0x3]  ;;  %v961_v46 = vld [vmem:[%s3004_s17 + $0xf0] sm:$0xff] }
 0x10f   :  { %1782 = vmatpush3.msra.mxu1 %v334_v2  ;;  %1807 = vmatmul.mubr.msk.f32.vlgmr.msra.gmra.mxu0 %vm431_vm3, %v589_v9  ;;  %v839_v31 = vld [vmem:[%s3039_s15] sm:$0x3]  ;;  %v851_v47 = vrot.slane %v2633_v42, %v2631_v40  ;;  %v960_v48 = vld [vmem:[%s3004_s17 + $0xe8] sm:$0xff]  ;;  %v958_v51 = vld [vmem:[%s3004_s17 + $0xd8] sm:$0xff]  ;;  %p2293_p5 = por %p2292_p4, %p2291_p3 }
 0x110   :  { %1783 = vmatprep.subr.mxu1 %v2354_v0  ;;  %1820 = vmatprep.mubr.msk.f32.mxu0 %vm2355_vm0, %v2354_v0  ;;  %v959_v50 = vld [vmem:[%s3004_s17 + $0xe0] sm:$0xff]  ;;  %v957_v53 = vld [vmem:[%s3004_s17 + $0xd0] sm:$0xff]  ;;  %v956_v55 = vld [vmem:[%s3004_s17 + $0xc8] sm:$0xff] }
 0x111   :  { %1784 = vmatpush3.msra.mxu1 %v333_v3  ;;  %1817 = vmatpush3.msra.mxu0 %v757_v32  ;;  %v955_v56 = vld [vmem:[%s3004_s17 + $0xc0] sm:$0xff]  ;;  %v954_v58 = vld [vmem:[%s3004_s17 + $0xb8] sm:$0xff]  ;;  %v953_v59 = vld [vmem:[%s3004_s17 + $0xb0] sm:$0xff]  ;;  %p2294_p6 = pnand %p2293_p5, %p2287_p2 }
 0x112   :  { %1786 = vmatmul.mubr.msk.f32.vlgmr.msra.gmra.mxu1 %vm343_vm2, %v332_v4  ;;  %1788 = vmatprep.subr.mxu1 %v2354_v0  ;;  %v952_v60 = vld [vmem:[%s3004_s17 + $0xa8] sm:$0xff]  ;;  %v951_v61 = vld [vmem:[%s3004_s17 + $0xa0] sm:$0xff]  ;;  %v950_v62 = vld [vmem:[%s3004_s17 + $0x98] sm:$0xff] }
 0x113   :  { %1792 = vmatprep.mubr.msk.f32.mxu1 %vm2355_vm0, %v2354_v0  ;;  %1789 = vmatpush3.msra.mxu1 %v423_v5  ;;  %v949_v63 = vld [vmem:[%s3004_s17 + $0x90] sm:$0xff]  ;;  %v948_v1 = vld [vmem:[%s3004_s17 + $0x88] sm:$0xff]  ;;  %v947_v2 = vld [vmem:[%s3004_s17 + $0x80] sm:$0xff] }
 0x114   :  { %1790 = vmatprep.subr.mxu1 %v2354_v0  ;;  %1818 = vmatprep.subr.mxu0 %v2354_v0  ;;  %v946_v3 = vld [vmem:[%s3004_s17 + $0x78] sm:$0xff]  ;;  %v945_v4 = vld [vmem:[%s3004_s17 + $0x70] sm:$0xff]  ;;  %v944_v5 = vld [vmem:[%s3004_s17 + $0x68] sm:$0xff] }
 0x115   :  { %1791 = vmatpush3.msra.mxu1 %v422_v6  ;;  %1819 = vmatpush3.msra.mxu0 %v756_v33  ;;  %v943_v6 = vld [vmem:[%s3004_s17 + $0x60] sm:$0xff]  ;;  %v942_v7 = vld [vmem:[%s3004_s17 + $0x58] sm:$0xff]  ;;  %v941_v8 = vld [vmem:[%s3004_s17 + $0x50] sm:$0xff] }
 0x116   :  { %1795 = vmatprep.subr.mxu1 %v2354_v0  ;;  %1007 = vmatprep.subr.mxu0 %v962_v34  ;;  %v940_v9 = vld [vmem:[%s3004_s17 + $0x48] sm:$0xff]  ;;  %v981_v32 = vld [vmem:[%s3004_s17 + $0x190] sm:$0xff]  ;;  %v979_v34 = vld [vmem:[%s3004_s17 + $0x180] sm:$0xff] }
 0x117   :  { %v980_v33 = vld [vmem:[%s3004_s17 + $0x188] sm:$0xff]  ;;  %v978_v35 = vld [vmem:[%s3004_s17 + $0x178] sm:$0xff] }
 0x1cf   :  { %v668_v16 = vpop.f32.mrf.mxu0 }
 0x1d0   :  { %v669_v23 = vadd.f32 %v1695_v20, %v668_v16  ;;  %v933_v16 = vld [vmem:[%s3004_s17 + $0x10] sm:$0xff] }
 0x1d1   :  { %v1808_v18 = vpop.f32.mrf.mxu0  ;;  %v993_v20 = vld [vmem:[%s3004_s17 + $0x1f0] sm:$0xff] }
 0x1d2   :  { %v417_v11 = vpop.f32.mrf.mxu1  ;;  %v672_v27 = vmax.f32 %v669_v23, 0.0  ;;  %v931_v18 = vld [vmem:[%s3004_s17] sm:$0xff]  ;;  %v990_v23 = vld [vmem:[%s3004_s17 + $0x1d8] sm:$0xff] }
 0x1d3   :  { %v418_v12 = vadd.f32 %v1688_v10, %v417_v11  ;;  %v939_v10 = vld [vmem:[%s3004_s17 + $0x40] sm:$0xff]  ;;  %v938_v11 = vld [vmem:[%s3004_s17 + $0x38] sm:$0xff] }
 0x1d4   :  { %v1787_v13 = vpop.f32.mrf.mxu1 }
 0x1d5   :  { %v421_v14 = vmax.f32 %v418_v12, 0.0  ;;  %v937_v12 = vld [vmem:[%s3004_s17 + $0x30] sm:$0xff]  ;;  %v936_v13 = vld [vmem:[%s3004_s17 + $0x28] sm:$0xff] }
 0x1d7   :  { %1793 = vmatmul.mubr.msk.f32.vlgmr.msra.gmra.mxu1 %vm431_vm3, %v421_v14  ;;  %v935_v14 = vld [vmem:[%s3004_s17 + $0x20] sm:$0xff] }
 0x1d8   :  { %1799 = vmatprep.mubr.msk.f32.mxu1 %vm2355_vm0, %v2354_v0  ;;  %1796 = vmatpush3.msra.mxu1 %v507_v15  ;;  %v934_v15 = vld [vmem:[%s3004_s17 + $0x18] sm:$0xff] }
 0x1d9   :  { %1797 = vmatprep.subr.mxu1 %v2354_v0 }
 0x1da   :  { %1798 = vmatpush3.msra.mxu1 %v506_v17  ;;  %v932_v17 = vld [vmem:[%s3004_s17 + $0x8] sm:$0xff] }
 0x1db   :  { %1809 = vmatprep.subr.mxu1 %v2354_v0 }
 0x297   :  { %v501_v21 = vpop.f32.mrf.mxu1 }
 0x298   :  { %v502_v22 = vadd.f32 %v1691_v19, %v501_v21  ;;  %v994_v19 = vld [vmem:[%s3004_s17 + $0x1f8] sm:$0xff]  ;;  %v992_v21 = vld [vmem:[%s3004_s17 + $0x1e8] sm:$0xff] }
 0x299   :  { %v1794_v24 = vpop.f32.mrf.mxu1 }
 0x29a   :  { %v505_v25 = vmax.f32 %v502_v22, 0.0  ;;  %v991_v22 = vld [vmem:[%s3004_s17 + $0x1e0] sm:$0xff]  ;;  %v989_v24 = vld [vmem:[%s3004_s17 + $0x1d0] sm:$0xff] }
 0x29c   :  { %1800 = vmatmul.mubr.msk.f32.vlgmr.msra.gmra.mxu1 %vm431_vm3, %v505_v25  ;;  %v988_v25 = vld [vmem:[%s3004_s17 + $0x1c8] sm:$0xff] }
 0x29d   :  { %1810 = vmatpush3.msra.mxu1 %v674_v26  ;;  %1813 = vmatprep.mubr.msk.f32.mxu1 %vm2355_vm0, %v2354_v0  ;;  %v987_v26 = vld [vmem:[%s3004_s17 + $0x1c0] sm:$0xff] }
 0x29e   :  { %1811 = vmatprep.subr.mxu1 %v2354_v0 }
 0x29f   :  { %1812 = vmatpush3.msra.mxu1 %v673_v28  ;;  %v985_v28 = vld [vmem:[%s3004_s17 + $0x1b0] sm:$0xff] }
 0x2a0   :  { %1814 = vmatmul.mubr.msk.f32.vlgmr.msra.gmra.mxu1 %vm431_vm3, %v672_v27  ;;  %888 = vmatprep.subr.mxu1 %v841_v29  ;;  %v986_v27 = vld [vmem:[%s3004_s17 + $0x1b8] sm:$0xff]  ;;  %v984_v29 = vld [vmem:[%s3004_s17 + $0x1a8] sm:$0xff] }
 0x2a1   :  { %889 = vmatpush1.msra.mxu1 %v840_v30  ;;  %922 = vmatprep.mubr.f32.mxu1 %v2354_v0  ;;  %v983_v30 = vld [vmem:[%s3004_s17 + $0x1a0] sm:$0xff] }
 0x2a4   :  { %1701 = vmatmul.mubr.msk.f32.vlgmr.msra.gmra.mxu1 %vm854_vm4, %v839_v31  ;;  %v982_v31 = vld [vmem:[%s3004_s17 + $0x198] sm:$0xff] }
 0x35c   :  { %v2628_v37 = vpop.f32.mrf.mxu1 }
 0x35e   :  { %v1801_v38 = vpop.f32.mrf.mxu1 }
 0x35f   :  { %v977_v38 = vld [vmem:[%s3004_s17 + $0x170] sm:$0xff] }
 0x360   :  { %v751_v41 = vpop.f32.mrf.mxu1 }
 0x361   :  { %v752_v43 = vadd.f32 %v1697_v39, %v751_v41  ;;  %v976_v39 = vld [vmem:[%s3004_s17 + $0x168] sm:$0xff]  ;;  %v975_v41 = vld [vmem:[%s3004_s17 + $0x160] sm:$0xff] }
 0x362   :  { %v1815_v44 = vpop.f32.mrf.mxu1 }
 0x363   :  { %v755_v45 = vmax.f32 %v752_v43, 0.0  ;;  %v974_v43 = vld [vmem:[%s3004_s17 + $0x158] sm:$0xff]  ;;  %v973_v44 = vld [vmem:[%s3004_s17 + $0x150] sm:$0xff] }
 0x364   :  { %v2643_v49 = vpop.f32.mrf.mxu1 }
 0x365   :  { %1821 = vmatmul.mubr.msk.f32.vlgmr.msra.gmra.mxu0 %vm431_vm3, %v755_v45  ;;  %v2800_v45 = vsub.s32 0, %v2626_v36  ;;  %v969_v36 = vld [vmem:[%s3004_s17 + $0x130] sm:$0xff] }
 0x366   :  { %1008 = vmatpush1.msra.mxu0 %v961_v46  ;;  %v926_v52 = vpop.f32.mrf.mxu1  ;;  %v972_v46 = vld [vmem:[%s3004_s17 + $0x148] sm:$0xff] }
 0x367   :  { %1009 = vmatprep.subr.mxu0 %v960_v48  ;;  %v927_v54 = vadd.f32 %v926_v52, %v851_v47  ;;  %v971_v47 = vld [vmem:[%s3004_s17 + $0x140] sm:$0xff]  ;;  %v970_v48 = vld [vmem:[%s3004_s17 + $0x138] sm:$0xff] }
 0x368   :  { %1010 = vmatpush1.msra.mxu0 %v959_v50  ;;  %v847_v50 = vrot.slane %v2633_v42, %v2800_v45  ;;  %v967_v52 = vld [vmem:[%s3004_s17 + $0x120] sm:$0xff]  ;;  %v966_v42 = vld [vmem:[%s3004_s17 + $0x118] sm:$0xff] }
 0x369   :  { %1011 = vmatprep.subr.mxu0 %v958_v51  ;;  %v930_v57 = vmax.f32 %v927_v54, 0.0  ;;  %v968_v51 = vld [vmem:[%s3004_s17 + $0x128] sm:$0xff]  ;;  %v965_v54 = vld [vmem:[%s3004_s17 + $0x110] sm:$0xff] }
 0x36a   :  { %1012 = vmatpush1.msra.mxu0 %v957_v53  ;;  %v925_v53 = vadd.f32 %v2643_v49, %v847_v50  ;;  %v1232_v49 = vld [vmem:[%s3008_s21 + $0x18] sm:$0xff]  ;;  %v1127_v50 = vld [vmem:[#allocation25 + $0x178] sm:$0xff] }
 0x36b   :  { %1013 = vmatprep.subr.mxu0 %v956_v55  ;;  %1071 = vmatprep.mubr.f32.mxu0 %v930_v57  ;;  %v964_v55 = vld [vmem:[%s3004_s17 + $0x108] sm:$0xff] }
 0x36c   :  { %1014 = vmatpush1.msra.mxu0 %v955_v56  ;;  %v963_v56 = vld [vmem:[%s3004_s17 + $0x100] sm:$0xff]  ;;  %v929_v57 = vmax.f32 %v925_v53, 0.0 }
 0x36d   :  { %1015 = vmatprep.subr.mxu0 %v954_v58  ;;  %v1231_v58 = vld [vmem:[%s3008_s21 + $0x10] sm:$0xff]  ;;  %v1122_v53 = vld [vmem:[#allocation25 + $0x150] sm:$0xff] }
 0x36e   :  { %1016 = vmatpush1.msra.mxu0 %v953_v59  ;;  %v1111_v59 = vld [vmem:[#allocation25 + $0xf8] sm:$0xff] }
 0x36f   :  { %1017 = vmatprep.subr.mxu0 %v952_v60  ;;  %v1110_v60 = vld [vmem:[#allocation25 + $0xf0] sm:$0xff]  ;;  %1156 = vmatprep.subr.mxu1 %v1111_v59  ;;  %v1115_v59 = vld [vmem:[#allocation25 + $0x118] sm:$0xff] }
 0x370   :  { %1018 = vmatpush1.msra.mxu0 %v951_v61  ;;  %v1109_v61 = vld [vmem:[#allocation25 + $0xe8] sm:$0xff]  ;;  %1157 = vmatpush1.msra.mxu1 %v1110_v60  ;;  %v1114_v60 = vld [vmem:[#allocation25 + $0x110] sm:$0xff] }
 0x371   :  { %1019 = vmatprep.subr.mxu0 %v950_v62  ;;  %v1108_v62 = vld [vmem:[#allocation25 + $0xe0] sm:$0xff]  ;;  %1158 = vmatprep.subr.mxu1 %v1109_v61  ;;  %v1113_v61 = vld [vmem:[#allocation25 + $0x108] sm:$0xff] }
 0x372   :  { %1020 = vmatpush1.msra.mxu0 %v949_v63  ;;  %v1107_v63 = vld [vmem:[#allocation25 + $0xd8] sm:$0xff]  ;;  %1159 = vmatpush1.msra.mxu1 %v1108_v62  ;;  %v1112_v62 = vld [vmem:[#allocation25 + $0x100] sm:$0xff] }
 0x373   :  { %1021 = vmatprep.subr.mxu0 %v948_v1  ;;  %v1106_v1 = vld [vmem:[#allocation25 + $0xd0] sm:$0xff]  ;;  %1160 = vmatprep.subr.mxu1 %v1107_v63  ;;  %v1699_v63 = vld [vmem:[#allocation19] ss:$0 sm:$0xff] }
 0x374   :  { %1022 = vmatpush1.msra.mxu0 %v947_v2  ;;  %v1105_v2 = vld [vmem:[#allocation25 + $0xc8] sm:$0xff]  ;;  %1161 = vmatpush1.msra.mxu1 %v1106_v1 }
 0x375   :  { %1023 = vmatprep.subr.mxu0 %v946_v3  ;;  %v1104_v3 = vld [vmem:[#allocation25 + $0xc0] sm:$0xff]  ;;  %1162 = vmatprep.subr.mxu1 %v1105_v2 }
 0x376   :  { %1024 = vmatpush1.msra.mxu0 %v945_v4  ;;  %v1103_v4 = vld [vmem:[#allocation25 + $0xb8] sm:$0xff]  ;;  %1163 = vmatpush1.msra.mxu1 %v1104_v3 }
 0x377   :  { %1025 = vmatprep.subr.mxu0 %v944_v5  ;;  %v1102_v5 = vld [vmem:[#allocation25 + $0xb0] sm:$0xff]  ;;  %1164 = vmatprep.subr.mxu1 %v1103_v4 }
 0x378   :  { %1026 = vmatpush1.msra.mxu0 %v943_v6  ;;  %v1101_v6 = vld [vmem:[#allocation25 + $0xa8] sm:$0xff]  ;;  %1165 = vmatpush1.msra.mxu1 %v1102_v5  ;;  %v995_v5 = vld [vmem:[#allocation23] sm:$0x3] }
 0x379   :  { %1027 = vmatprep.subr.mxu0 %v942_v7  ;;  %v1100_v7 = vld [vmem:[#allocation25 + $0xa0] sm:$0xff]  ;;  %1166 = vmatprep.subr.mxu1 %v1101_v6  ;;  %v1000_v6 = vrot.slane %v995_v5, %v2800_v45 }
 0x37a   :  { %1028 = vmatpush1.msra.mxu0 %v941_v8  ;;  %v1099_v8 = vld [vmem:[#allocation25 + $0x98] sm:$0xff]  ;;  %1167 = vmatpush1.msra.mxu1 %v1100_v7  ;;  %v1004_v7 = vrot.slane %v995_v5, %v2631_v40 }
 0x37b   :  { %1029 = vmatprep.subr.mxu0 %v940_v9  ;;  %v1098_v9 = vld [vmem:[#allocation25 + $0x90] sm:$0xff]  ;;  %1168 = vmatprep.subr.mxu1 %v1099_v8 }
 0x37c   :  { %1030 = vmatpush1.msra.mxu0 %v939_v10  ;;  %v1097_v10 = vld [vmem:[#allocation25 + $0x88] sm:$0xff]  ;;  %1169 = vmatpush1.msra.mxu1 %v1098_v9 }
 0x37d   :  { %1031 = vmatprep.subr.mxu0 %v938_v11  ;;  %v1096_v11 = vld [vmem:[#allocation25 + $0x80] sm:$0xff]  ;;  %1170 = vmatprep.subr.mxu1 %v1097_v10 }
 0x37e   :  { %1032 = vmatpush1.msra.mxu0 %v937_v12  ;;  %v1095_v12 = vld [vmem:[#allocation25 + $0x78] sm:$0xff]  ;;  %1171 = vmatpush1.msra.mxu1 %v1096_v11  ;;  %v1693_v11 = vld [vmem:[#allocation10] ss:$0 sm:$0xff] }
 0x37f   :  { %1033 = vmatprep.subr.mxu0 %v936_v13  ;;  %v1094_v13 = vld [vmem:[#allocation25 + $0x70] sm:$0xff]  ;;  %1172 = vmatprep.subr.mxu1 %v1095_v12 }
 0x380   :  { %1034 = vmatpush1.msra.mxu0 %v935_v14  ;;  %v1093_v14 = vld [vmem:[#allocation25 + $0x68] sm:$0xff]  ;;  %1173 = vmatpush1.msra.mxu1 %v1094_v13 }
 0x381   :  { %1035 = vmatprep.subr.mxu0 %v934_v15  ;;  %v1092_v15 = vld [vmem:[#allocation25 + $0x60] sm:$0xff]  ;;  %1174 = vmatprep.subr.mxu1 %v1093_v14  ;;  %v585_v14 = vadd.f32 %v1693_v11, %v2628_v37 }
 0x382   :  { %1036 = vmatpush1.msra.mxu0 %v933_v16  ;;  %v1091_v16 = vld [vmem:[#allocation25 + $0x58] sm:$0xff]  ;;  %1175 = vmatpush1.msra.mxu1 %v1092_v15  ;;  %v1263_v37 = vld [vmem:[%s3008_s21 + $0x110] sm:$0xff] }
 0x383   :  { %1037 = vmatprep.subr.mxu0 %v932_v17  ;;  %v1090_v17 = vld [vmem:[#allocation25 + $0x50] sm:$0xff]  ;;  %1176 = vmatprep.subr.mxu1 %v1091_v16  ;;  %v1230_v16 = vld [vmem:[%s3008_s21 + $0x8] sm:$0xff] }
 0x384   :  { %1038 = vmatpush1.msra.mxu0 %v931_v18  ;;  %v1089_v18 = vld [vmem:[#allocation25 + $0x48] sm:$0xff]  ;;  %1177 = vmatpush1.msra.mxu1 %v1090_v17 }
 0x385   :  { %1039 = vmatprep.subr.mxu0 %v994_v19  ;;  %v1088_v19 = vld [vmem:[#allocation25 + $0x40] sm:$0xff]  ;;  %1178 = vmatprep.subr.mxu1 %v1089_v18  ;;  %v1264_v17 = vld [vmem:[%s3008_s21 + $0x118] sm:$0xff] }
 0x386   :  { %1040 = vmatpush2.msra.mxu0 %v993_v20  ;;  %v1087_v20 = vld [vmem:[#allocation25 + $0x38] sm:$0xff]  ;;  %1179 = vmatpush1.msra.mxu1 %v1088_v19  ;;  %v1248_v18 = vld [vmem:[%s3008_s21 + $0x98] sm:$0xff]  ;;  %v1229_v19 = vld [vmem:[%s3008_s21] sm:$0xff] }
 0x387   :  { %1041 = vmatprep.subr.mxu0 %v992_v21  ;;  %v1086_v21 = vld [vmem:[#allocation25 + $0x30] sm:$0xff]  ;;  %1180 = vmatprep.subr.mxu1 %v1087_v20  ;;  %v1247_v20 = vld [vmem:[%s3008_s21 + $0x90] sm:$0xff] }
 0x388   :  { %1042 = vmatpush2.msra.mxu0 %v991_v22  ;;  %v1085_v22 = vld [vmem:[#allocation25 + $0x28] sm:$0xff]  ;;  %1181 = vmatpush1.msra.mxu1 %v1086_v21  ;;  %v588_v21 = vmax.f32 %v585_v14, 0.0  ;;  %v1579_v14 = vld [vmem:[%s3012_s25 + $0x10] sm:$0xff] }
 0x389   :  { %1043 = vmatprep.subr.mxu0 %v990_v23  ;;  %v1084_v23 = vld [vmem:[#allocation25 + $0x20] sm:$0xff]  ;;  %1182 = vmatprep.subr.mxu1 %v1085_v22  ;;  %v1262_v22 = vld [vmem:[%s3008_s21 + $0x108] sm:$0xff] }
 0x38a   :  { %1044 = vmatpush2.msra.mxu0 %v989_v24  ;;  %v1083_v24 = vld [vmem:[#allocation25 + $0x18] sm:$0xff]  ;;  %1183 = vmatpush1.msra.mxu1 %v1084_v23 }
 0x38b   :  { %1045 = vmatprep.subr.mxu0 %v988_v25  ;;  %v1082_v25 = vld [vmem:[#allocation25 + $0x10] sm:$0xff]  ;;  %1184 = vmatprep.subr.mxu1 %v1083_v24  ;;  %v1246_v23 = vld [vmem:[%s3008_s21 + $0x88] sm:$0xff] }
 0x38c   :  { %1046 = vmatpush2.msra.mxu0 %v987_v26  ;;  %v1081_v26 = vld [vmem:[#allocation25 + $0x8] sm:$0xff]  ;;  %1185 = vmatpush1.msra.mxu1 %v1082_v25  ;;  %v1261_v24 = vld [vmem:[%s3008_s21 + $0x100] sm:$0xff] }
 0x38d   :  { %1047 = vmatprep.subr.mxu0 %v986_v27  ;;  %v1080_v27 = vld [vmem:[#allocation25] sm:$0xff]  ;;  %1186 = vmatprep.subr.mxu1 %v1081_v26  ;;  %v1245_v25 = vld [vmem:[%s3008_s21 + $0x80] sm:$0xff]  ;;  %v1260_v26 = vld [vmem:[%s3008_s21 + $0xf8] sm:$0xff] }
 0x38e   :  { %1048 = vmatpush2.msra.mxu0 %v985_v28  ;;  %v1143_v28 = vld [vmem:[#allocation25 + $0x1f8] sm:$0xff]  ;;  %1187 = vmatpush1.msra.mxu1 %v1080_v27  ;;  %v1244_v27 = vld [vmem:[%s3008_s21 + $0x78] sm:$0xff] }
 0x38f   :  { %1049 = vmatprep.subr.mxu0 %v984_v29  ;;  %v1142_v29 = vld [vmem:[#allocation25 + $0x1f0] sm:$0xff]  ;;  %1188 = vmatprep.subr.mxu1 %v1143_v28  ;;  %v1259_v28 = vld [vmem:[%s3008_s21 + $0xf0] sm:$0xff] }
 0x390   :  { %1050 = vmatpush2.msra.mxu0 %v983_v30  ;;  %v1141_v30 = vld [vmem:[#allocation25 + $0x1e8] sm:$0xff]  ;;  %1189 = vmatpush2.msra.mxu1 %v1142_v29  ;;  %v1243_v29 = vld [vmem:[%s3008_s21 + $0x70] sm:$0xff] }
 0x391   :  { %1051 = vmatprep.subr.mxu0 %v982_v31  ;;  %v1140_v31 = vld [vmem:[#allocation25 + $0x1e0] sm:$0xff]  ;;  %1190 = vmatprep.subr.mxu1 %v1141_v30  ;;  %v1258_v30 = vld [vmem:[%s3008_s21 + $0xe8] sm:$0xff] }
 0x392   :  { %1052 = vmatpush2.msra.mxu0 %v981_v32  ;;  %v1139_v32 = vld [vmem:[#allocation25 + $0x1d8] sm:$0xff]  ;;  %1191 = vmatpush2.msra.mxu1 %v1140_v31 }
 0x393   :  { %1053 = vmatprep.subr.mxu0 %v980_v33  ;;  %v1138_v33 = vld [vmem:[#allocation25 + $0x1d0] sm:$0xff]  ;;  %1192 = vmatprep.subr.mxu1 %v1139_v32  ;;  %v1242_v31 = vld [vmem:[%s3008_s21 + $0x68] sm:$0xff] }
 0x394   :  { %1054 = vmatpush2.msra.mxu0 %v979_v34  ;;  %v1137_v34 = vld [vmem:[#allocation25 + $0x1c8] sm:$0xff]  ;;  %1193 = vmatpush2.msra.mxu1 %v1138_v33  ;;  %v1257_v32 = vld [vmem:[%s3008_s21 + $0xe0] sm:$0xff] }
 0x395   :  { %1055 = vmatprep.subr.mxu0 %v978_v35  ;;  %v1136_v35 = vld [vmem:[#allocation25 + $0x1c0] sm:$0xff]  ;;  %1194 = vmatprep.subr.mxu1 %v1137_v34  ;;  %v1241_v33 = vld [vmem:[%s3008_s21 + $0x60] sm:$0xff]  ;;  %v1256_v34 = vld [vmem:[%s3008_s21 + $0xd8] sm:$0xff] }
 0x396   :  { %1056 = vmatpush2.msra.mxu0 %v977_v38  ;;  %v1135_v38 = vld [vmem:[#allocation25 + $0x1b8] sm:$0xff]  ;;  %1195 = vmatpush2.msra.mxu1 %v1136_v35  ;;  %v1240_v35 = vld [vmem:[%s3008_s21 + $0x58] sm:$0xff] }
 0x397   :  { %1057 = vmatprep.subr.mxu0 %v976_v39  ;;  %v1134_v39 = vld [vmem:[#allocation25 + $0x1b0] sm:$0xff]  ;;  %1196 = vmatprep.subr.mxu1 %v1135_v38  ;;  %v1255_v38 = vld [vmem:[%s3008_s21 + $0xd0] sm:$0xff] }
 0x398   :  { %1058 = vmatpush2.msra.mxu0 %v975_v41  ;;  %v1133_v41 = vld [vmem:[#allocation25 + $0x1a8] sm:$0xff]  ;;  %1197 = vmatpush2.msra.mxu1 %v1134_v39  ;;  %v1239_v39 = vld [vmem:[%s3008_s21 + $0x50] sm:$0xff] }
 0x399   :  { %1059 = vmatprep.subr.mxu0 %v974_v43  ;;  %v1132_v43 = vld [vmem:[#allocation25 + $0x1a0] sm:$0xff]  ;;  %1198 = vmatprep.subr.mxu1 %v1133_v41  ;;  %v1254_v41 = vld [vmem:[%s3008_s21 + $0xc8] sm:$0xff] }
 0x39a   :  { %1060 = vmatpush2.msra.mxu0 %v973_v44  ;;  %v1131_v44 = vld [vmem:[#allocation25 + $0x198] sm:$0xff]  ;;  %1199 = vmatpush2.msra.mxu1 %v1132_v43 }
 0x39b   :  { %1061 = vmatprep.subr.mxu0 %v972_v46  ;;  %v1130_v46 = vld [vmem:[#allocation25 + $0x190] sm:$0xff]  ;;  %1200 = vmatprep.subr.mxu1 %v1131_v44  ;;  %v1238_v43 = vld [vmem:[%s3008_s21 + $0x48] sm:$0xff] }
 0x39c   :  { %1062 = vmatpush2.msra.mxu0 %v971_v47  ;;  %v1129_v47 = vld [vmem:[#allocation25 + $0x188] sm:$0xff]  ;;  %1201 = vmatpush2.msra.mxu1 %v1130_v46  ;;  %v1253_v44 = vld [vmem:[%s3008_s21 + $0xc0] sm:$0xff] }
 0x39d   :  { %1063 = vmatprep.subr.mxu0 %v970_v48  ;;  %v1128_v48 = vld [vmem:[#allocation25 + $0x180] sm:$0xff]  ;;  %1202 = vmatprep.subr.mxu1 %v1129_v47  ;;  %v1237_v46 = vld [vmem:[%s3008_s21 + $0x40] sm:$0xff]  ;;  %v1252_v47 = vld [vmem:[%s3008_s21 + $0xb8] sm:$0xff] }
 0x39e   :  { %1064 = vmatpush2.msra.mxu0 %v969_v36  ;;  %v1126_v36 = vld [vmem:[#allocation25 + $0x170] sm:$0xff]  ;;  %1203 = vmatpush2.msra.mxu1 %v1128_v48  ;;  %v1236_v48 = vld [vmem:[%s3008_s21 + $0x38] sm:$0xff] }
 0x39f   :  { %1065 = vmatprep.subr.mxu0 %v968_v51  ;;  %v1125_v51 = vld [vmem:[#allocation25 + $0x168] sm:$0xff]  ;;  %1204 = vmatprep.subr.mxu1 %v1127_v50  ;;  %v1251_v50 = vld [vmem:[%s3008_s21 + $0xb0] sm:$0xff] }
 0x3a0   :  { %1066 = vmatpush2.msra.mxu0 %v967_v52  ;;  %v1124_v52 = vld [vmem:[#allocation25 + $0x160] sm:$0xff]  ;;  %1205 = vmatpush2.msra.mxu1 %v1126_v36 }
 0x3a1   :  { %1067 = vmatprep.subr.mxu0 %v966_v42  ;;  %v1123_v42 = vld [vmem:[#allocation25 + $0x158] sm:$0xff]  ;;  %1206 = vmatprep.subr.mxu1 %v1125_v51  ;;  %v1235_v36 = vld [vmem:[%s3008_s21 + $0x30] sm:$0xff] }
 0x3a2   :  { %1068 = vmatpush2.msra.mxu0 %v965_v54  ;;  %1207 = vmatpush2.msra.mxu1 %v1124_v52  ;;  %v1121_v54 = vld [vmem:[#allocation25 + $0x148] sm:$0xff]  ;;  %v1250_v51 = vld [vmem:[%s3008_s21 + $0xa8] sm:$0xff] }
 0x3a3   :  { %1069 = vmatprep.subr.mxu0 %v964_v55  ;;  %1208 = vmatprep.subr.mxu1 %v1123_v42  ;;  %v1120_v55 = vld [vmem:[#allocation25 + $0x140] sm:$0xff]  ;;  %v1234_v52 = vld [vmem:[%s3008_s21 + $0x28] sm:$0xff]  ;;  %v1249_v42 = vld [vmem:[%s3008_s21 + $0xa0] sm:$0xff] }
 0x3a4   :  { %1070 = vmatpush2.msra.mxu0 %v963_v56  ;;  %1209 = vmatpush2.msra.mxu1 %v1122_v53  ;;  %v1119_v56 = vld [vmem:[#allocation25 + $0x138] sm:$0xff]  ;;  %v1233_v53 = vld [vmem:[%s3008_s21 + $0x20] sm:$0xff] }
 0x3a5   :  { %1072 = vmatmul.mubr.f32.vlgmr.msra.gmra.mxu0 %v929_v57  ;;  %1823 = vmatprep.subr.mxu0 %v2354_v0  ;;  %v1118_v57 = vld [vmem:[#allocation25 + $0x130] sm:$0xff] }
 0x3a6   :  { %1827 = vmatprep.mubr.msk.f32.mxu0 %vm2355_vm0, %v2354_v0  ;;  %1824 = vmatpush3.msra.mxu0 %v1232_v49  ;;  %v1117_v49 = vld [vmem:[#allocation25 + $0x128] sm:$0xff] }
 0x3a7   :  { %1825 = vmatprep.subr.mxu0 %v2354_v0  ;;  %1210 = vmatprep.subr.mxu1 %v1121_v54 }
 0x3a8   :  { %1826 = vmatpush3.msra.mxu0 %v1231_v58  ;;  %1211 = vmatpush2.msra.mxu1 %v1120_v55  ;;  %v1116_v58 = vld [vmem:[#allocation25 + $0x120] sm:$0xff] }
 0x3a9   :  { %1212 = vmatprep.subr.mxu1 %v1119_v56  ;;  %1734 = vmatprep.subr.mxu0 %v1264_v17  ;;  %v1144_v56 = vld [vmem:[#allocation26] sm:$0x3]  ;;  %v1705_v17 = vld [vmem:[#allocation31] ss:$0 sm:$0xff] }
 0x3aa   :  { %1213 = vmatpush2.msra.mxu1 %v1118_v57  ;;  %v1149_v57 = vrot.slane %v1144_v56, %v2800_v45  ;;  %v1492_v45 = vld [vmem:[#allocation29 + $0x8] sm:$0xff] }
 0x3ab   :  { %1214 = vmatprep.subr.mxu1 %v1117_v49  ;;  %v1153_v49 = vrot.slane %v1144_v56, %v2631_v40  ;;  %v1491_v40 = vld [vmem:[#allocation29] sm:$0xff] }
 0x3ac   :  { %1215 = vmatpush2.msra.mxu1 %v1116_v58 }
 0x3ad   :  { %1216 = vmatprep.subr.mxu1 %v1115_v59 }
 0x3ae   :  { %1217 = vmatpush2.msra.mxu1 %v1114_v60 }
 0x3af   :  { %1218 = vmatprep.subr.mxu1 %v1113_v61 }
 0x3b0   :  { %1219 = vmatpush2.msra.mxu1 %v1112_v62 }
 0x3b1   :  { %1830 = vmatprep.subr.mxu1 %v2354_v0 }
 0x425   :  { %v834_v1 = vpop.f32.mrf.mxu0 }
 0x426   :  { %v835_v2 = vadd.f32 %v1699_v63, %v834_v1 }
 0x427   :  { %v1822_v3 = vpop.f32.mrf.mxu0 }
 0x428   :  { %v838_v4 = vmax.f32 %v835_v2, 0.0  ;;  %v1494_v3 = vld [vmem:[#allocation29 + $0x18] sm:$0xff] }
 0x42a   :  { %1828 = vmatmul.mubr.msk.f32.vlgmr.msra.gmra.mxu0 %vm431_vm3, %v838_v4  ;;  %v1493_v4 = vld [vmem:[#allocation29 + $0x10] sm:$0xff] }
 0x42b   :  { %1735 = vmatpush3.msra.mxu0 %v1248_v18 }
 0x42c   :  { %1736 = vmatprep.subr.mxu0 %v1263_v37 }
 0x42d   :  { %1737 = vmatpush3.msra.mxu0 %v1247_v20 }
 0x42e   :  { %1738 = vmatprep.subr.mxu0 %v1262_v22 }
 0x42f   :  { %1739 = vmatpush3.msra.mxu0 %v1246_v23 }
 0x430   :  { %1740 = vmatprep.subr.mxu0 %v1261_v24 }
 0x431   :  { %1741 = vmatpush3.msra.mxu0 %v1245_v25 }
 0x432   :  { %1742 = vmatprep.subr.mxu0 %v1260_v26 }
 0x433   :  { %1743 = vmatpush3.msra.mxu0 %v1244_v27 }
 0x434   :  { %1744 = vmatprep.subr.mxu0 %v1259_v28 }
 0x435   :  { %1745 = vmatpush3.msra.mxu0 %v1243_v29 }
 0x436   :  { %1746 = vmatprep.subr.mxu0 %v1258_v30 }
 0x437   :  { %1747 = vmatpush3.msra.mxu0 %v1242_v31 }
 0x438   :  { %1748 = vmatprep.subr.mxu0 %v1257_v32 }
 0x439   :  { %1749 = vmatpush3.msra.mxu0 %v1241_v33 }
 0x43a   :  { %1750 = vmatprep.subr.mxu0 %v1256_v34 }
 0x43b   :  { %1751 = vmatpush3.msra.mxu0 %v1240_v35 }
 0x43c   :  { %1752 = vmatprep.subr.mxu0 %v1255_v38 }
 0x43d   :  { %1753 = vmatpush3.msra.mxu0 %v1239_v39 }
 0x43e   :  { %1754 = vmatprep.subr.mxu0 %v1254_v41 }
 0x43f   :  { %1755 = vmatpush3.msra.mxu0 %v1238_v43 }
 0x440   :  { %1756 = vmatprep.subr.mxu0 %v1253_v44 }
 0x441   :  { %1757 = vmatpush3.msra.mxu0 %v1237_v46 }
 0x442   :  { %1758 = vmatprep.subr.mxu0 %v1252_v47 }
 0x443   :  { %1759 = vmatpush3.msra.mxu0 %v1236_v48 }
 0x444   :  { %1760 = vmatprep.subr.mxu0 %v1251_v50 }
 0x445   :  { %1761 = vmatpush3.msra.mxu0 %v1235_v36 }
 0x446   :  { %1762 = vmatprep.subr.mxu0 %v1250_v51 }
 0x447   :  { %1763 = vmatpush3.msra.mxu0 %v1234_v52 }
 0x448   :  { %1764 = vmatprep.subr.mxu0 %v1249_v42 }
 0x449   :  { %1765 = vmatpush3.msra.mxu0 %v1233_v53 }
 0x465   :  { %v1073_v8 = vpop.f32.mrf.mxu0 }
 0x466   :  { %v1074_v9 = vadd.f32 %v1073_v8, %v1000_v6 }
 0x467   :  { %v1075_v10 = vpop.f32.mrf.mxu0 }
 0x468   :  { %v1076_v12 = vadd.f32 %v1075_v10, %v1004_v7  ;;  %v1078_v15 = vmax.f32 %v1074_v9, 0.0  ;;  %v1704_v9 = vld [vmem:[#allocation28] ss:$0 sm:$0xff] }
 0x46a   :  { %v1079_v13 = vmax.f32 %v1076_v12, 0.0 }
 0x46c   :  { %1220 = vmatprep.mubr.f32.mxu1 %v1079_v13  ;;  %v1580_v13 = vld [vmem:[%s3012_s25 + $0x18] sm:$0xff] }
 0x46d   :  { %1221 = vmatmul.mubr.f32.vlgmr.msra.gmra.mxu1 %v1078_v15  ;;  %v1578_v15 = vld [vmem:[%s3012_s25 + $0x8] sm:$0xff] }
 0x46e   :  { %1831 = vmatpush3.msra.mxu1 %v1230_v16  ;;  %1834 = vmatprep.mubr.msk.f32.mxu1 %vm2355_vm0, %v2354_v0  ;;  %v1577_v16 = vld [vmem:[%s3012_s25] sm:$0xff] }
 0x46f   :  { %1832 = vmatprep.subr.mxu1 %v2354_v0 }
 0x470   :  { %1833 = vmatpush3.msra.mxu1 %v1229_v19 }
 0x471   :  { %1835 = vmatmul.mubr.msk.f32.vlgmr.msra.gmra.mxu1 %vm431_vm3, %v588_v21  ;;  %1837 = vmatprep.subr.mxu1 %v2354_v0  ;;  %v1707_v21 = vld [vmem:[#allocation32] ss:$0 sm:$0xff] }
 0x472   :  { %1845 = vmatprep.mubr.msk.f32.mxu1 %vm2355_vm0, %v2354_v0  ;;  %1838 = vmatpush3.msra.mxu1 %v1494_v3 }
 0x473   :  { %1839 = vmatprep.subr.mxu1 %v2354_v0 }
 0x474   :  { %1840 = vmatpush3.msra.mxu1 %v1493_v4 }
 0x475   :  { %1841 = vmatprep.subr.mxu1 %v2354_v0 }
 0x476   :  { %1842 = vmatpush3.msra.mxu1 %v1492_v45 }
 0x477   :  { %1843 = vmatprep.subr.mxu1 %v2354_v0 }
 0x478   :  { %1844 = vmatpush3.msra.mxu1 %v1491_v40 }
 0x479   :  { %1848 = vmatprep.subr.mxu1 %v2354_v0 }
 0x4ea   :  { %v1334_v54 = vpop.f32.mrf.mxu0 }
 0x4ec   :  { %v1829_v55 = vpop.f32.mrf.mxu0 }
 0x52d   :  { %v1222_v58 = vpop.f32.mrf.mxu1 }
 0x52e   :  { %v1223_v59 = vadd.f32 %v1222_v58, %v1149_v57 }
 0x52f   :  { %v1224_v60 = vpop.f32.mrf.mxu1 }
 0x530   :  { %v1225_v61 = vadd.f32 %v1224_v60, %v1153_v49  ;;  %v1227_v1 = vmax.f32 %v1223_v59, 0.0 }
 0x531   :  { %v1407_v62 = vpop.f32.mrf.mxu1 }
 0x532   :  { %v1228_v63 = vmax.f32 %v1225_v61, 0.0  ;;  %v1408_v7 = vadd.f32 %v1407_v62, %v1334_v54 }
 0x533   :  { %v1836_v2 = vpop.f32.mrf.mxu1 }
 0x534   :  { %1475 = vmatprep.mubr.f32.mxu0 %v1228_v63 }
 0x535   :  { %1476 = vmatmul.mubr.f32.vlgmr.msra.gmra.mxu0 %v1227_v1 }
 0x5f5   :  { %v1766_v5 = vpop.f32.mrf.mxu0 }
 0x5f7   :  { %v1767_v6 = vpop.f32.mrf.mxu0 }
 0x5f8   :  { %v1768_v8 = vadd.f32 %v1767_v6, %v1766_v5 }
 0x5fa   :  { %v1481_v10 = vadd.f32 %v1768_v8, %v1408_v7 }
 0x5fc   :  { %v1489_v11 = vadd.f32 %v1704_v9, %v1481_v10 }
 0x5fe   :  { %v1490_v12 = vmax.f32 %v1489_v11, 0.0 }
 0x600   :  { %1846 = vmatmul.mubr.msk.f32.vlgmr.msra.gmra.mxu1 %vm1502_vm5, %v1490_v12 }
 0x601   :  { %1849 = vmatpush3.msra.mxu1 %v1580_v13  ;;  %1856 = vmatprep.mubr.msk.f32.mxu1 %vm2355_vm0, %v2354_v0 }
 0x602   :  { %1850 = vmatprep.subr.mxu1 %v2354_v0 }
 0x603   :  { %1851 = vmatpush3.msra.mxu1 %v1579_v14 }
 0x604   :  { %1852 = vmatprep.subr.mxu1 %v2354_v0 }
 0x605   :  { %1853 = vmatpush3.msra.mxu1 %v1578_v15 }
 0x606   :  { %1854 = vmatprep.subr.mxu1 %v2354_v0 }
 0x607   :  { %1855 = vmatpush3.msra.mxu1 %v1577_v16 }
 0x6c0   :  { %v1572_v18 = vpop.f32.mrf.mxu1 }
 0x6c1   :  { %v1573_v19 = vadd.f32 %v1705_v17, %v1572_v18 }
 0x6c2   :  { %v1847_v37 = vpop.f32.mrf.mxu1 }
 0x6c3   :  { %v1576_v20 = vmax.f32 %v1573_v19, 0.0 }
 0x6c5   :  { %1857 = vmatmul.mubr.msk.f32.vlgmr.msra.gmra.mxu1 %vm1502_vm5, %v1576_v20 }
 0x785   :  { %v1657_v22 = vpop.f32.mrf.mxu1 }
 0x786   :  { %v1658_v23 = vadd.f32 %v1707_v21, %v1657_v22 }
 0x787   :  { %v1858_v0 = vpop.f32.mrf.mxu1 }
 0x788   :  { %1662 = vst.msk [vmem:[#allocation34] sm:$0x3] %vm1661_vm6, %v1658_v23 }
 0x789   :  { %2297 = shalt.err (!%p2294_p6)
}
 0x78a   :  { %1672 = dma.vmem_to_hbm [thread:$0]  %s1670_s14, 32, %s3014_s27, [#allocation4]  }
 0x78b   :  { %2328 = dma.done.wait [#allocation4], 32  }
 0x78c   :  { %2329 = vsyncadd [#allocation4], 4294967264 }
 0x78d   :  { %1676 = vsyncpa [#allocation3], 1 }
 0x78e   :  { %1677 = vsyncpa [#allocation6], 1 }
 0x78f   :  { %1678 = vsyncpa [#allocation9], 1 }
 0x790   :  { %1679 = vsyncpa [#allocation12], 1 }
 0x791   :  { %1680 = vsyncpa [#allocation15], 1 }
 0x792   :  { %1681 = vsyncpa [#allocation18], 1 }
 0x793   :  { %1682 = vsyncpa [#allocation21], 1 }
 0x794   :  { %1683 = vsyncpa [#allocation24], 1 }
 0x795   :  { %1684 = vsyncpa [#allocation27], 1 }
 0x796   :  { %1685 = vsyncpa [#allocation30], 1 }
 0x797   :  { %1686 = vsyncpa [#allocation33], 1 }
 0x798   :  { %1687 = vsyncpa [#allocation4], 1 }

</bundles_post_ra>
